<compile_context>
chip_gen: v7x
topology: tpu7x:2x2x1
jax: 0.10.0
libtpu: 0.0.40
codegen_flags: <defaults>
</compile_context>

<pallas_src>
import functools
import math

import jax
import jax.numpy as jnp
from jax.experimental import pallas as pl
from jax.experimental.pallas import tpu as pltpu


def _layer_norm(y, gamma, beta, eps):
    mean = jnp.mean(y, axis=-1, keepdims=True)
    var = jnp.mean(jnp.square(y - mean), axis=-1, keepdims=True)
    return (y - mean) * jax.lax.rsqrt(var + eps) * gamma + beta


# ----------------------------------------------------------------------------
# Fused kernel: CPE depthwise conv + residual, fused-QKV multi-head attention
# with XSoftmax masking + SelfOutput LayerNorm, Intermediate GELU + Output
# dense + residual LayerNorm.  One grid step = one batch row.
# ----------------------------------------------------------------------------
def layer_kernel(x_ref, mask_ref, cpe_w_ref, cpe_b_ref,
                 wqkv_ref, bqkv_ref, wo_ref, bo_ref, g1_ref, b1_ref,
                 wi_ref, bi_ref, wo2_ref, bo2_ref, g2_ref, b2_ref,
                 out_ref, ctx_ref, *, num_heads, head_dim, cpe_k, eps):
    f32 = jnp.float32
    dt = x_ref.dtype                     # compute dtype of MXU operands (bf16/f32)
    L, H = out_ref.shape[1], out_ref.shape[2]
    pad = cpe_k // 2

    # ---- CPE: depthwise Conv1d over the sequence axis + residual ------------
    # Halo handled in-kernel: sublane roll (XLU) + a (L,1) boundary-row mask,
    # no padded HBM copy and no full (L,H) iota/compares per tap.
    x = x_ref[0].astype(f32)                                   # (L, H)
    cpe_w = cpe_w_ref[...].astype(f32)                         # (K, H) taps
    row_col = jax.lax.broadcasted_iota(jnp.int32, (L, 1), 0)   # (L, 1)
    conv = jnp.zeros((L, H), f32)
    for k in range(cpe_k):                                     # static tap unroll
        off = k - pad
        w_k = cpe_w[k:k + 1, :]                                # (1, H)
        if off == 0:
            conv = conv + x * w_k
        else:
            shifted = pltpu.roll(x, (-off) % L, axis=0)        # shifted[l] = x[l+off]
            valid = jnp.logical_and(row_col + off >= 0, row_col + off < L)  # (L,1)
            conv = conv + jnp.where(valid, shifted, 0.0) * w_k
    h = x + conv + cpe_b_ref[...].astype(f32)                  # residual: x + conv(x)

    # ---- Attention: one fused QKV matmul (scale pre-folded into Wq) ---------
    qkv = (jnp.dot(h.astype(dt), wqkv_ref[...], preferred_element_type=f32)
           + bqkv_ref[...].astype(f32))                        # (L, 3H) f32
    qkv = qkv.astype(dt)                                       # single cast, sliced below

    mask = mask_ref[0] > 0                                     # (1, L) key-position mask
    neg = jnp.finfo(f32).min
    mask_bias = jnp.where(mask, 0.0, neg).astype(f32)          # (1, L), hoisted
    keep = mask.astype(f32)                                    # (1, L) post-softmax zeroing
    approx_recip = dt != jnp.float32                           # exact on f32 check path

    # TODO(synk): at production NH (e.g. 24) convert this static unroll to a
    # lax.fori_loop over heads with 128-aligned (or leading-axis) per-head
    # q/k/v slices to bound vreg live ranges; fine at NH=4.
    for hh in range(num_heads):                                # static head unroll
        lo = hh * head_dim
        qh = qkv[:, lo:lo + head_dim]
        kh = qkv[:, H + lo:H + lo + head_dim]
        vh = qkv[:, 2 * H + lo:2 * H + lo + head_dim]
        s = jax.lax.dot_general(qh, kh, (((1,), (1,)), ((), ())),
                                preferred_element_type=f32) + mask_bias
        e = jnp.exp(s - jnp.max(s, axis=-1, keepdims=True))
        p = e * pl.reciprocal(jnp.sum(e, axis=-1, keepdims=True), approx=approx_recip)
        p = p * keep                                           # XSoftmax post-mask
        ctx_ref[:, lo:lo + head_dim] = jnp.dot(
            p.astype(dt), vh, preferred_element_type=f32).astype(dt)
    # One K=H output projection (fills MXU depth vs. NH K=head_dim matmuls).
    attn = jnp.dot(ctx_ref[...], wo_ref[...], preferred_element_type=f32)
    a = _layer_norm(attn + bo_ref[...].astype(f32) + h,
                    g1_ref[...].astype(f32), b1_ref[...].astype(f32), eps)

    # ---- Intermediate (dense + GELU) + Output (dense + residual LayerNorm) --
    inter = (jnp.dot(a.astype(dt), wi_ref[...], preferred_element_type=f32)
             + bi_ref[...].astype(f32))
    # TODO(synk): HF "gelu" is erf-exact; using tanh-approx GELU (no erf lowering).
    c = math.sqrt(2.0 / math.pi)
    inter = 0.5 * inter * (1.0 + jnp.tanh(c * (inter + 0.044715 * inter ** 3)))
    y = (jnp.dot(inter.astype(dt), wo2_ref[...], preferred_element_type=f32)
         + bo2_ref[...].astype(f32))
    out_ref[0] = _layer_norm(y + a, g2_ref[...].astype(f32),
                             b2_ref[...].astype(f32), eps).astype(out_ref.dtype)


def _vmem_limit_bytes():
    # Derive the scoped-VMEM limit from the chip (cap below physical):
    # ~48 MiB on v7x (64 MiB physical), ~100 MiB on v5e/v6e (128 MiB physical).
    try:
        info = pltpu.get_tpu_info()
        phys = getattr(info, "vmem_capacity_bytes", None) or 128 * 1024 * 1024
        return int(min(phys * 3 // 4, 100 * 1024 * 1024))
    except Exception:
        return 64 * 1024 * 1024


# ----------------------------------------------------------------------------
# Wrapper: parameter packing / dtype casting in plain JAX; hot path in Pallas.
# ----------------------------------------------------------------------------
def deberta_v2_layer_cpe(hidden_states, attention_mask, params, *, num_heads,
                         eps=1e-7, compute_dtype=jnp.bfloat16):
    B, L, H = hidden_states.shape
    head_dim = H // num_heads
    K = params["cpe_w"].shape[0]
    I = params["wi"].shape[1]
    out_dtype = hidden_states.dtype
    dt = compute_dtype
    cast = lambda a: a.astype(dt)

    # Fuse Q/K/V projections into one (H, 3H) operand; fold 1/sqrt(hd) into Wq/bq.
    scale = 1.0 / math.sqrt(head_dim)
    wqkv = jnp.concatenate([params["wq"] * scale, params["wk"], params["wv"]], axis=1)
    bqkv = jnp.concatenate([params["bq"] * scale, params["bk"], params["bv"]], axis=1)

    x = cast(hidden_states)
    mask3 = attention_mask.reshape(B, 1, L).astype(jnp.float32)

    row = lambda b: (b, 0, 0)
    full2d = lambda b: (0, 0)
    kernel = functools.partial(layer_kernel, num_heads=num_heads,
                               head_dim=head_dim, cpe_k=K, eps=eps)

    # TODO(synk): at prod shapes mark the four big weight BlockSpecs with
    # pipeline_mode=pl.Buffered(1) (their index_map is constant across B) so
    # they are not double-buffered on v7x's 64 MiB VMEM.
    return pl.pallas_call(
        kernel,
        out_shape=jax.ShapeDtypeStruct((B, L, H), out_dtype),
        grid=(B,),
        in_specs=[pl.BlockSpec((1, L, H), row),          # hidden_states
                  pl.BlockSpec((1, 1, L), row),          # attention mask (keys)
                  pl.BlockSpec((K, H), full2d),          # cpe depthwise taps
                  pl.BlockSpec((1, H), full2d),          # cpe bias
                  pl.BlockSpec((H, 3 * H), full2d),      # fused Wqkv (q pre-scaled)
                  pl.BlockSpec((1, 3 * H), full2d),      # fused bqkv
                  pl.BlockSpec((H, H), full2d),          # Wo
                  pl.BlockSpec((1, H), full2d),          # bo
                  pl.BlockSpec((1, H), full2d),          # ln1 gamma
                  pl.BlockSpec((1, H), full2d),          # ln1 beta
                  pl.BlockSpec((H, I), full2d),          # Wi
                  pl.BlockSpec((1, I), full2d),          # bi
                  pl.BlockSpec((I, H), full2d),          # Wo2
                  pl.BlockSpec((1, H), full2d),          # bo2
                  pl.BlockSpec((1, H), full2d),          # ln2 gamma
                  pl.BlockSpec((1, H), full2d)],         # ln2 beta
        out_specs=pl.BlockSpec((1, L, H), row),
        scratch_shapes=[pltpu.VMEM((L, H), dt)],         # resident per-head ctx slab
        compiler_params=pltpu.CompilerParams(
            dimension_semantics=("parallel",),
            vmem_limit_bytes=_vmem_limit_bytes()),
    )(x, mask3, cast(params["cpe_w"]), cast(params["cpe_b"]),
      cast(wqkv), cast(bqkv), cast(params["wo"]), cast(params["bo"]),
      cast(params["ln1_g"]), cast(params["ln1_b"]),
      cast(params["wi"]), cast(params["bi"]), cast(params["wo2"]),
      cast(params["bo2"]), cast(params["ln2_g"]), cast(params["ln2_b"]))


# ----------------------------------------------------------------------------
# Pure-JAX reference (same math, f32, exact softmax) for a correctness check.
# ----------------------------------------------------------------------------
def reference(hidden_states, attention_mask, params, num_heads, eps=1e-7):
    B, L, H = hidden_states.shape
    hd = H // num_heads
    K = params["cpe_w"].shape[0]
    pad = K // 2
    xpad = jnp.pad(hidden_states, ((0, 0), (pad, pad), (0, 0)))
    conv = sum(xpad[:, k:k + L, :] * params["cpe_w"][k][None, None, :]
               for k in range(K)) + params["cpe_b"][0]
    h = hidden_states + conv

    def ln(y, g, b):
        m = y.mean(-1, keepdims=True)
        v = ((y - m) ** 2).mean(-1, keepdims=True)
        return (y - m) / jnp.sqrt(v + eps) * g + b

    q = (h @ params["wq"] + params["bq"][0]).reshape(B, L, num_heads, hd).transpose(0, 2, 1, 3)
    k = (h @ params["wk"] + params["bk"][0]).reshape(B, L, num_heads, hd).transpose(0, 2, 1, 3)
    v = (h @ params["wv"] + params["bv"][0]).reshape(B, L, num_heads, hd).transpose(0, 2, 1, 3)
    s = jnp.einsum('bhid,bhjd->bhij', q, k) / math.sqrt(hd)
    m = attention_mask[:, None, None, :].astype(jnp.float32)
    s = jnp.where(m > 0, s, jnp.finfo(jnp.float32).min)
    p = jax.nn.softmax(s, axis=-1)
    p = jnp.where(m > 0, p, 0.0)
    ctx = jnp.einsum('bhij,bhjd->bhid', p, v).transpose(0, 2, 1, 3).reshape(B, L, H)
    attn = ln(ctx @ params["wo"] + params["bo"][0] + h, params["ln1_g"][0], params["ln1_b"][0])
    inter = attn @ params["wi"] + params["bi"][0]
    c = math.sqrt(2.0 / math.pi)
    inter = 0.5 * inter * (1.0 + jnp.tanh(c * (inter + 0.044715 * inter ** 3)))
    return ln(inter @ params["wo2"] + params["bo2"][0] + attn,
              params["ln2_g"][0], params["ln2_b"][0])


if __name__ == "__main__":
    # config: hidden=32, heads=4, intermediate=64, seq=8, batch=2, cpe_kernel_size=3
    B, L, H, NH, I, K = 2, 8, 32, 4, 64, 3
    std = 0.02
    key = jax.random.PRNGKey(0)
    ks = jax.random.split(key, 16)

    params = {
        "cpe_w": jax.random.normal(ks[0], (K, H), jnp.float32) * std,   # depthwise taps (k, channel)
        "cpe_b": jax.random.normal(ks[1], (1, H), jnp.float32) * std,
        "wq": jax.random.normal(ks[2], (H, H), jnp.float32) * std,
        "bq": jnp.zeros((1, H), jnp.float32),
        "wk": jax.random.normal(ks[3], (H, H), jnp.float32) * std,
        "bk": jnp.zeros((1, H), jnp.float32),
        "wv": jax.random.normal(ks[4], (H, H), jnp.float32) * std,
        "bv": jnp.zeros((1, H), jnp.float32),
        "wo": jax.random.normal(ks[5], (H, H), jnp.float32) * std,
        "bo": jax.random.normal(ks[6], (1, H), jnp.float32) * std,
        "ln1_g": jnp.ones((1, H), jnp.float32),
        "ln1_b": jnp.zeros((1, H), jnp.float32),
        "wi": jax.random.normal(ks[7], (H, I), jnp.float32) * std,
        "bi": jax.random.normal(ks[8], (1, I), jnp.float32) * std,
        "wo2": jax.random.normal(ks[9], (I, H), jnp.float32) * std,
        "bo2": jax.random.normal(ks[10], (1, H), jnp.float32) * std,
        "ln2_g": jnp.ones((1, H), jnp.float32),
        "ln2_b": jnp.zeros((1, H), jnp.float32),
    }

    hidden = jax.random.normal(ks[11], (B, L, H), jnp.float32)
    mask = jnp.ones((B, L), jnp.float32).at[1, L - 2:].set(0.0)   # last 2 keys of batch 1 masked

    with jax.default_matmul_precision("float32"):
        ref = reference(hidden, mask, params, NH)

    # f32 compute path (exact reciprocal): tight check of the fused-kernel math.
    out_f32 = deberta_v2_layer_cpe(hidden, mask, params, num_heads=NH,
                                   compute_dtype=jnp.float32)
    out_f32 = jax.block_until_ready(out_f32)
    assert out_f32.shape == (B, L, H)
    err_f32 = float(jnp.max(jnp.abs(out_f32 - ref)))
    assert err_f32 < 1e-2, f"f32 max abs error {err_f32}"

    # bf16 compute path (production dtype): looser check vs f32 reference.
    out_bf16 = deberta_v2_layer_cpe(hidden, mask, params, num_heads=NH,
                                    compute_dtype=jnp.bfloat16)
    out_bf16 = jax.block_until_ready(out_bf16)
    err_bf16 = float(jnp.max(jnp.abs(out_bf16.astype(jnp.float32) - ref)))
    assert err_bf16 < 6e-2, f"bf16 max abs error {err_bf16}"

    print("KERNEL_OK")
</pallas_src>

<mosaic_0001>
module attributes {stable_mosaic.version = 11 : i64} {
  func.func @layer_kernel(%arg0: i32, %arg1: memref<1x8x32xf32, #tpu.memory_space<vmem>>, %arg2: memref<1x1x8xf32, #tpu.memory_space<vmem>>, %arg3: memref<3x32xf32, #tpu.memory_space<vmem>>, %arg4: memref<1x32xf32, #tpu.memory_space<vmem>>, %arg5: memref<32x96xf32, #tpu.memory_space<vmem>>, %arg6: memref<1x96xf32, #tpu.memory_space<vmem>>, %arg7: memref<32x32xf32, #tpu.memory_space<vmem>>, %arg8: memref<1x32xf32, #tpu.memory_space<vmem>>, %arg9: memref<1x32xf32, #tpu.memory_space<vmem>>, %arg10: memref<1x32xf32, #tpu.memory_space<vmem>>, %arg11: memref<32x64xf32, #tpu.memory_space<vmem>>, %arg12: memref<1x64xf32, #tpu.memory_space<vmem>>, %arg13: memref<64x32xf32, #tpu.memory_space<vmem>>, %arg14: memref<1x32xf32, #tpu.memory_space<vmem>>, %arg15: memref<1x32xf32, #tpu.memory_space<vmem>>, %arg16: memref<1x32xf32, #tpu.memory_space<vmem>>, %arg17: memref<1x8x32xf32, #tpu.memory_space<vmem>>, %arg18: memref<8x32xf32, #tpu.memory_space<vmem>>) attributes {dimension_semantics = [#tpu.dimension_semantics<parallel>], iteration_bounds = array<i64: 2>, scalar_prefetch = 0 : i64, scratch_operands = 1 : i64, tpu.core_type = #tpu.core_type<tc>, window_params = [{transform_indices = @transform_0, window_bounds = array<i64: 1, 8, 32>}, {transform_indices = @transform_1, window_bounds = array<i64: 1, 1, 8>}, {pipeline_mode = #tpu.pipeline_mode<synchronous>, transform_indices = @transform_2, window_bounds = array<i64: 3, 32>}, {pipeline_mode = #tpu.pipeline_mode<synchronous>, transform_indices = @transform_3, window_bounds = array<i64: 1, 32>}, {pipeline_mode = #tpu.pipeline_mode<synchronous>, transform_indices = @transform_4, window_bounds = array<i64: 32, 96>}, {pipeline_mode = #tpu.pipeline_mode<synchronous>, transform_indices = @transform_5, window_bounds = array<i64: 1, 96>}, {pipeline_mode = #tpu.pipeline_mode<synchronous>, transform_indices = @transform_6, window_bounds = array<i64: 32, 32>}, {pipeline_mode = #tpu.pipeline_mode<synchronous>, transform_indices = @transform_7, window_bounds = array<i64: 1, 32>}, {pipeline_mode = #tpu.pipeline_mode<synchronous>, transform_indices = @transform_8, window_bounds = array<i64: 1, 32>}, {pipeline_mode = #tpu.pipeline_mode<synchronous>, transform_indices = @transform_9, window_bounds = array<i64: 1, 32>}, {pipeline_mode = #tpu.pipeline_mode<synchronous>, transform_indices = @transform_10, window_bounds = array<i64: 32, 64>}, {pipeline_mode = #tpu.pipeline_mode<synchronous>, transform_indices = @transform_11, window_bounds = array<i64: 1, 64>}, {pipeline_mode = #tpu.pipeline_mode<synchronous>, transform_indices = @transform_12, window_bounds = array<i64: 64, 32>}, {pipeline_mode = #tpu.pipeline_mode<synchronous>, transform_indices = @transform_13, window_bounds = array<i64: 1, 32>}, {pipeline_mode = #tpu.pipeline_mode<synchronous>, transform_indices = @transform_14, window_bounds = array<i64: 1, 32>}, {pipeline_mode = #tpu.pipeline_mode<synchronous>, transform_indices = @transform_15, window_bounds = array<i64: 1, 32>}, {transform_indices = @transform_16, window_bounds = array<i64: 1, 8, 32>}]} {
    %c0 = arith.constant 0 : index
    %c0_0 = arith.constant 0 : index
    %c0_1 = arith.constant 0 : index
    %0 = vector.load %arg1[%c0, %c0_0, %c0_1] : memref<1x8x32xf32, #tpu.memory_space<vmem>>, vector<1x8x32xf32>
    %1 = vector.shape_cast %0 : vector<1x8x32xf32> to vector<8x32xf32>
    %c0_2 = arith.constant 0 : index
    %c0_3 = arith.constant 0 : index
    %2 = vector.load %arg3[%c0_2, %c0_3] : memref<3x32xf32, #tpu.memory_space<vmem>>, vector<3x32xf32>
    %3 = tpu.iota {dimensions = array<i32: 0>} : vector<8x1xi32>
    %cst = arith.constant 0.000000e+00 : f32
    %4 = vector.broadcast %cst : f32 to vector<8x32xf32>
    %5 = vector.extract_strided_slice %2 {offsets = [0, 0], sizes = [1, 32], strides = [1, 1]} : vector<3x32xf32> to vector<1x32xf32>
    %c1_i32 = arith.constant 1 : i32
    %6 = tpu.dynamic_rotate %1 by %c1_i32 dim 0 : vector<8x32xf32>, i32 -> vector<8x32xf32>
    %c-1_i32 = arith.constant -1 : i32
    %7 = vector.broadcast %c-1_i32 : i32 to vector<8x1xi32>
    %8 = arith.addi %3, %7 : vector<8x1xi32>
    %c0_i32 = arith.constant 0 : i32
    %9 = vector.broadcast %c0_i32 : i32 to vector<8x1xi32>
    %10 = arith.cmpi sge, %8, %9 : vector<8x1xi32>
    %c-1_i32_4 = arith.constant -1 : i32
    %11 = vector.broadcast %c-1_i32_4 : i32 to vector<8x1xi32>
    %12 = arith.addi %3, %11 : vector<8x1xi32>
    %c8_i32 = arith.constant 8 : i32
    %13 = vector.broadcast %c8_i32 : i32 to vector<8x1xi32>
    %14 = arith.cmpi slt, %12, %13 : vector<8x1xi32>
    %15 = arith.andi %10, %14 : vector<8x1xi1>
    %cst_5 = arith.constant 0.000000e+00 : f32
    %16 = vector.shape_cast %15 : vector<8x1xi1> to vector<8x1xi1>
    %17 = vector.broadcast %16 : vector<8x1xi1> to vector<8x32xi1>
    %18 = vector.broadcast %cst_5 : f32 to vector<8x32xf32>
    %19 = arith.select %17, %6, %18 : vector<8x32xi1>, vector<8x32xf32>
    %20 = vector.broadcast %5 : vector<1x32xf32> to vector<8x32xf32>
    %21 = arith.mulf %19, %20 : vector<8x32xf32>
    %22 = arith.addf %4, %21 : vector<8x32xf32>
    %23 = vector.extract_strided_slice %2 {offsets = [1, 0], sizes = [1, 32], strides = [1, 1]} : vector<3x32xf32> to vector<1x32xf32>
    %24 = vector.broadcast %23 : vector<1x32xf32> to vector<8x32xf32>
    %25 = arith.mulf %1, %24 : vector<8x32xf32>
    %26 = arith.addf %22, %25 : vector<8x32xf32>
    %27 = vector.extract_strided_slice %2 {offsets = [2, 0], sizes = [1, 32], strides = [1, 1]} : vector<3x32xf32> to vector<1x32xf32>
    %c7_i32 = arith.constant 7 : i32
    %28 = tpu.dynamic_rotate %1 by %c7_i32 dim 0 : vector<8x32xf32>, i32 -> vector<8x32xf32>
    %c1_i32_6 = arith.constant 1 : i32
    %29 = vector.broadcast %c1_i32_6 : i32 to vector<8x1xi32>
    %30 = arith.addi %3, %29 : vector<8x1xi32>
    %c0_i32_7 = arith.constant 0 : i32
    %31 = vector.broadcast %c0_i32_7 : i32 to vector<8x1xi32>
    %32 = arith.cmpi sge, %30, %31 : vector<8x1xi32>
    %c1_i32_8 = arith.constant 1 : i32
    %33 = vector.broadcast %c1_i32_8 : i32 to vector<8x1xi32>
    %34 = arith.addi %3, %33 : vector<8x1xi32>
    %c8_i32_9 = arith.constant 8 : i32
    %35 = vector.broadcast %c8_i32_9 : i32 to vector<8x1xi32>
    %36 = arith.cmpi slt, %34, %35 : vector<8x1xi32>
    %37 = arith.andi %32, %36 : vector<8x1xi1>
    %cst_10 = arith.constant 0.000000e+00 : f32
    %38 = vector.shape_cast %37 : vector<8x1xi1> to vector<8x1xi1>
    %39 = vector.broadcast %38 : vector<8x1xi1> to vector<8x32xi1>
    %40 = vector.broadcast %cst_10 : f32 to vector<8x32xf32>
    %41 = arith.select %39, %28, %40 : vector<8x32xi1>, vector<8x32xf32>
    %42 = vector.broadcast %27 : vector<1x32xf32> to vector<8x32xf32>
    %43 = arith.mulf %41, %42 : vector<8x32xf32>
    %44 = arith.addf %26, %43 : vector<8x32xf32>
    %45 = arith.addf %1, %44 : vector<8x32xf32>
    %c0_11 = arith.constant 0 : index
    %c0_12 = arith.constant 0 : index
    %46 = vector.load %arg4[%c0_11, %c0_12] : memref<1x32xf32, #tpu.memory_space<vmem>>, vector<1x32xf32>
    %47 = vector.broadcast %46 : vector<1x32xf32> to vector<8x32xf32>
    %48 = arith.addf %45, %47 : vector<8x32xf32>
    %c0_13 = arith.constant 0 : index
    %c0_14 = arith.constant 0 : index
    %49 = vector.load %arg5[%c0_13, %c0_14] : memref<32x96xf32, #tpu.memory_space<vmem>>, vector<32x96xf32>
    %cst_15 = arith.constant dense<0.000000e+00> : vector<8x96xf32>
    %50 = tpu.matmul %48, %49, %cst_15 {dimension_numbers = #tpu.dot_dimension_numbers<[1], [0], [0], [1], [0, 0, 1, 1], [], []>} : vector<8x32xf32>, vector<32x96xf32>, vector<8x96xf32> -> vector<8x96xf32>
    %c0_16 = arith.constant 0 : index
    %c0_17 = arith.constant 0 : index
    %51 = vector.load %arg6[%c0_16, %c0_17] : memref<1x96xf32, #tpu.memory_space<vmem>>, vector<1x96xf32>
    %52 = vector.broadcast %51 : vector<1x96xf32> to vector<8x96xf32>
    %53 = arith.addf %50, %52 : vector<8x96xf32>
    %c0_18 = arith.constant 0 : index
    %c0_19 = arith.constant 0 : index
    %c0_20 = arith.constant 0 : index
    %54 = vector.load %arg2[%c0_18, %c0_19, %c0_20] : memref<1x1x8xf32, #tpu.memory_space<vmem>>, vector<1x1x8xf32>
    %55 = vector.shape_cast %54 : vector<1x1x8xf32> to vector<1x8xf32>
    %cst_21 = arith.constant 0.000000e+00 : f32
    %56 = vector.broadcast %cst_21 : f32 to vector<1x8xf32>
    %57 = arith.cmpf ogt, %55, %56 : vector<1x8xf32>
    %cst_22 = arith.constant 0.000000e+00 : f32
    %cst_23 = arith.constant -3.40282347E+38 : f32
    %58 = vector.broadcast %cst_22 : f32 to vector<1x8xf32>
    %59 = vector.broadcast %cst_23 : f32 to vector<1x8xf32>
    %60 = arith.select %57, %58, %59 : vector<1x8xi1>, vector<1x8xf32>
    %61 = arith.extui %57 : vector<1x8xi1> to vector<1x8xi32>
    %62 = arith.sitofp %61 : vector<1x8xi32> to vector<1x8xf32>
    %63 = vector.extract_strided_slice %53 {offsets = [0, 0], sizes = [8, 8], strides = [1, 1]} : vector<8x96xf32> to vector<8x8xf32>
    %64 = vector.extract_strided_slice %53 {offsets = [0, 32], sizes = [8, 8], strides = [1, 1]} : vector<8x96xf32> to vector<8x8xf32>
    %65 = vector.extract_strided_slice %53 {offsets = [0, 64], sizes = [8, 8], strides = [1, 1]} : vector<8x96xf32> to vector<8x8xf32>
    %cst_24 = arith.constant dense<0.000000e+00> : vector<8x8xf32>
    %66 = tpu.matmul %63, %64, %cst_24 {dimension_numbers = #tpu.dot_dimension_numbers<[1], [1], [0], [0], [0, 0, 1, 0], [], []>} : vector<8x8xf32>, vector<8x8xf32>, vector<8x8xf32> -> vector<8x8xf32>
    %67 = vector.broadcast %60 : vector<1x8xf32> to vector<8x8xf32>
    %68 = arith.addf %66, %67 : vector<8x8xf32>
    %cst_25 = arith.constant dense<0xFF800000> : vector<8xf32>
    %69 = vector.multi_reduction <maximumf>, %68, %cst_25 [1] : vector<8x8xf32> to vector<8xf32>
    %70 = vector.shape_cast %69 : vector<8xf32> to vector<8x1xf32>
    %71 = vector.broadcast %70 : vector<8x1xf32> to vector<8x8xf32>
    %72 = arith.subf %68, %71 : vector<8x8xf32>
    %73 = math.exp %72 : vector<8x8xf32>
    %cst_26 = arith.constant dense<0.000000e+00> : vector<8xf32>
    %74 = vector.multi_reduction <add>, %73, %cst_26 [1] : vector<8x8xf32> to vector<8xf32>
    %75 = vector.shape_cast %74 : vector<8xf32> to vector<8x1xf32>
    %76 = tpu.reciprocal %75 : vector<8x1xf32> -> vector<8x1xf32>
    %77 = vector.broadcast %76 : vector<8x1xf32> to vector<8x8xf32>
    %78 = arith.mulf %73, %77 : vector<8x8xf32>
    %79 = vector.broadcast %62 : vector<1x8xf32> to vector<8x8xf32>
    %80 = arith.mulf %78, %79 : vector<8x8xf32>
    %cst_27 = arith.constant dense<0.000000e+00> : vector<8x8xf32>
    %81 = tpu.matmul %80, %65, %cst_27 {dimension_numbers = #tpu.dot_dimension_numbers<[1], [0], [0], [1], [0, 0, 1, 1], [], []>} : vector<8x8xf32>, vector<8x8xf32>, vector<8x8xf32> -> vector<8x8xf32>
    %c0_28 = arith.constant 0 : index
    %c0_29 = arith.constant 0 : index
    %82 = vector.load %arg18[%c0_28, %c0_29] : memref<8x32xf32, #tpu.memory_space<vmem>>, vector<8x8xf32>
    tpu.vector_store %arg18[%c0_28, %c0_29], %81 {strides = array<i32>} : memref<8x32xf32, #tpu.memory_space<vmem>>, vector<8x8xf32>,
    %83 = vector.extract_strided_slice %53 {offsets = [0, 8], sizes = [8, 8], strides = [1, 1]} : vector<8x96xf32> to vector<8x8xf32>
    %84 = vector.extract_strided_slice %53 {offsets = [0, 40], sizes = [8, 8], strides = [1, 1]} : vector<8x96xf32> to vector<8x8xf32>
    %85 = vector.extract_strided_slice %53 {offsets = [0, 72], sizes = [8, 8], strides = [1, 1]} : vector<8x96xf32> to vector<8x8xf32>
    %cst_30 = arith.constant dense<0.000000e+00> : vector<8x8xf32>
    %86 = tpu.matmul %83, %84, %cst_30 {dimension_numbers = #tpu.dot_dimension_numbers<[1], [1], [0], [0], [0, 0, 1, 0], [], []>} : vector<8x8xf32>, vector<8x8xf32>, vector<8x8xf32> -> vector<8x8xf32>
    %87 = vector.broadcast %60 : vector<1x8xf32> to vector<8x8xf32>
    %88 = arith.addf %86, %87 : vector<8x8xf32>
    %cst_31 = arith.constant dense<0xFF800000> : vector<8xf32>
    %89 = vector.multi_reduction <maximumf>, %88, %cst_31 [1] : vector<8x8xf32> to vector<8xf32>
    %90 = vector.shape_cast %89 : vector<8xf32> to vector<8x1xf32>
    %91 = vector.broadcast %90 : vector<8x1xf32> to vector<8x8xf32>
    %92 = arith.subf %88, %91 : vector<8x8xf32>
    %93 = math.exp %92 : vector<8x8xf32>
    %cst_32 = arith.constant dense<0.000000e+00> : vector<8xf32>
    %94 = vector.multi_reduction <add>, %93, %cst_32 [1] : vector<8x8xf32> to vector<8xf32>
    %95 = vector.shape_cast %94 : vector<8xf32> to vector<8x1xf32>
    %96 = tpu.reciprocal %95 : vector<8x1xf32> -> vector<8x1xf32>
    %97 = vector.broadcast %96 : vector<8x1xf32> to vector<8x8xf32>
    %98 = arith.mulf %93, %97 : vector<8x8xf32>
    %99 = vector.broadcast %62 : vector<1x8xf32> to vector<8x8xf32>
    %100 = arith.mulf %98, %99 : vector<8x8xf32>
    %cst_33 = arith.constant dense<0.000000e+00> : vector<8x8xf32>
    %101 = tpu.matmul %100, %85, %cst_33 {dimension_numbers = #tpu.dot_dimension_numbers<[1], [0], [0], [1], [0, 0, 1, 1], [], []>} : vector<8x8xf32>, vector<8x8xf32>, vector<8x8xf32> -> vector<8x8xf32>
    %c0_34 = arith.constant 0 : index
    %c8 = arith.constant 8 : index
    %102 = vector.load %arg18[%c0_34, %c8] : memref<8x32xf32, #tpu.memory_space<vmem>>, vector<8x8xf32>
    tpu.vector_store %arg18[%c0_34, %c8], %101 {strides = array<i32>} : memref<8x32xf32, #tpu.memory_space<vmem>>, vector<8x8xf32>,
    %103 = vector.extract_strided_slice %53 {offsets = [0, 16], sizes = [8, 8], strides = [1, 1]} : vector<8x96xf32> to vector<8x8xf32>
    %104 = vector.extract_strided_slice %53 {offsets = [0, 48], sizes = [8, 8], strides = [1, 1]} : vector<8x96xf32> to vector<8x8xf32>
    %105 = vector.extract_strided_slice %53 {offsets = [0, 80], sizes = [8, 8], strides = [1, 1]} : vector<8x96xf32> to vector<8x8xf32>
    %cst_35 = arith.constant dense<0.000000e+00> : vector<8x8xf32>
    %106 = tpu.matmul %103, %104, %cst_35 {dimension_numbers = #tpu.dot_dimension_numbers<[1], [1], [0], [0], [0, 0, 1, 0], [], []>} : vector<8x8xf32>, vector<8x8xf32>, vector<8x8xf32> -> vector<8x8xf32>
    %107 = vector.broadcast %60 : vector<1x8xf32> to vector<8x8xf32>
    %108 = arith.addf %106, %107 : vector<8x8xf32>
    %cst_36 = arith.constant dense<0xFF800000> : vector<8xf32>
    %109 = vector.multi_reduction <maximumf>, %108, %cst_36 [1] : vector<8x8xf32> to vector<8xf32>
    %110 = vector.shape_cast %109 : vector<8xf32> to vector<8x1xf32>
    %111 = vector.broadcast %110 : vector<8x1xf32> to vector<8x8xf32>
    %112 = arith.subf %108, %111 : vector<8x8xf32>
    %113 = math.exp %112 : vector<8x8xf32>
    %cst_37 = arith.constant dense<0.000000e+00> : vector<8xf32>
    %114 = vector.multi_reduction <add>, %113, %cst_37 [1] : vector<8x8xf32> to vector<8xf32>
    %115 = vector.shape_cast %114 : vector<8xf32> to vector<8x1xf32>
    %116 = tpu.reciprocal %115 : vector<8x1xf32> -> vector<8x1xf32>
    %117 = vector.broadcast %116 : vector<8x1xf32> to vector<8x8xf32>
    %118 = arith.mulf %113, %117 : vector<8x8xf32>
    %119 = vector.broadcast %62 : vector<1x8xf32> to vector<8x8xf32>
    %120 = arith.mulf %118, %119 : vector<8x8xf32>
    %cst_38 = arith.constant dense<0.000000e+00> : vector<8x8xf32>
    %121 = tpu.matmul %120, %105, %cst_38 {dimension_numbers = #tpu.dot_dimension_numbers<[1], [0], [0], [1], [0, 0, 1, 1], [], []>} : vector<8x8xf32>, vector<8x8xf32>, vector<8x8xf32> -> vector<8x8xf32>
    %c0_39 = arith.constant 0 : index
    %c16 = arith.constant 16 : index
    %122 = vector.load %arg18[%c0_39, %c16] : memref<8x32xf32, #tpu.memory_space<vmem>>, vector<8x8xf32>
    tpu.vector_store %arg18[%c0_39, %c16], %121 {strides = array<i32>} : memref<8x32xf32, #tpu.memory_space<vmem>>, vector<8x8xf32>,
    %123 = vector.extract_strided_slice %53 {offsets = [0, 24], sizes = [8, 8], strides = [1, 1]} : vector<8x96xf32> to vector<8x8xf32>
    %124 = vector.extract_strided_slice %53 {offsets = [0, 56], sizes = [8, 8], strides = [1, 1]} : vector<8x96xf32> to vector<8x8xf32>
    %125 = vector.extract_strided_slice %53 {offsets = [0, 88], sizes = [8, 8], strides = [1, 1]} : vector<8x96xf32> to vector<8x8xf32>
    %cst_40 = arith.constant dense<0.000000e+00> : vector<8x8xf32>
    %126 = tpu.matmul %123, %124, %cst_40 {dimension_numbers = #tpu.dot_dimension_numbers<[1], [1], [0], [0], [0, 0, 1, 0], [], []>} : vector<8x8xf32>, vector<8x8xf32>, vector<8x8xf32> -> vector<8x8xf32>
    %127 = vector.broadcast %60 : vector<1x8xf32> to vector<8x8xf32>
    %128 = arith.addf %126, %127 : vector<8x8xf32>
    %cst_41 = arith.constant dense<0xFF800000> : vector<8xf32>
    %129 = vector.multi_reduction <maximumf>, %128, %cst_41 [1] : vector<8x8xf32> to vector<8xf32>
    %130 = vector.shape_cast %129 : vector<8xf32> to vector<8x1xf32>
    %131 = vector.broadcast %130 : vector<8x1xf32> to vector<8x8xf32>
    %132 = arith.subf %128, %131 : vector<8x8xf32>
    %133 = math.exp %132 : vector<8x8xf32>
    %cst_42 = arith.constant dense<0.000000e+00> : vector<8xf32>
    %134 = vector.multi_reduction <add>, %133, %cst_42 [1] : vector<8x8xf32> to vector<8xf32>
    %135 = vector.shape_cast %134 : vector<8xf32> to vector<8x1xf32>
    %136 = tpu.reciprocal %135 : vector<8x1xf32> -> vector<8x1xf32>
    %137 = vector.broadcast %136 : vector<8x1xf32> to vector<8x8xf32>
    %138 = arith.mulf %133, %137 : vector<8x8xf32>
    %139 = vector.broadcast %62 : vector<1x8xf32> to vector<8x8xf32>
    %140 = arith.mulf %138, %139 : vector<8x8xf32>
    %cst_43 = arith.constant dense<0.000000e+00> : vector<8x8xf32>
    %141 = tpu.matmul %140, %125, %cst_43 {dimension_numbers = #tpu.dot_dimension_numbers<[1], [0], [0], [1], [0, 0, 1, 1], [], []>} : vector<8x8xf32>, vector<8x8xf32>, vector<8x8xf32> -> vector<8x8xf32>
    %c0_44 = arith.constant 0 : index
    %c24 = arith.constant 24 : index
    %142 = vector.load %arg18[%c0_44, %c24] : memref<8x32xf32, #tpu.memory_space<vmem>>, vector<8x8xf32>
    tpu.vector_store %arg18[%c0_44, %c24], %141 {strides = array<i32>} : memref<8x32xf32, #tpu.memory_space<vmem>>, vector<8x8xf32>,
    %c0_45 = arith.constant 0 : index
    %c0_46 = arith.constant 0 : index
    %143 = vector.load %arg18[%c0_45, %c0_46] : memref<8x32xf32, #tpu.memory_space<vmem>>, vector<8x32xf32>
    %c0_47 = arith.constant 0 : index
    %c0_48 = arith.constant 0 : index
    %144 = vector.load %arg7[%c0_47, %c0_48] : memref<32x32xf32, #tpu.memory_space<vmem>>, vector<32x32xf32>
    %cst_49 = arith.constant dense<0.000000e+00> : vector<8x32xf32>
    %145 = tpu.matmul %143, %144, %cst_49 {dimension_numbers = #tpu.dot_dimension_numbers<[1], [0], [0], [1], [0, 0, 1, 1], [], []>} : vector<8x32xf32>, vector<32x32xf32>, vector<8x32xf32> -> vector<8x32xf32>
    %c0_50 = arith.constant 0 : index
    %c0_51 = arith.constant 0 : index
    %146 = vector.load %arg8[%c0_50, %c0_51] : memref<1x32xf32, #tpu.memory_space<vmem>>, vector<1x32xf32>
    %147 = vector.broadcast %146 : vector<1x32xf32> to vector<8x32xf32>
    %148 = arith.addf %145, %147 : vector<8x32xf32>
    %149 = arith.addf %148, %48 : vector<8x32xf32>
    %c0_52 = arith.constant 0 : index
    %c0_53 = arith.constant 0 : index
    %150 = vector.load %arg9[%c0_52, %c0_53] : memref<1x32xf32, #tpu.memory_space<vmem>>, vector<1x32xf32>
    %c0_54 = arith.constant 0 : index
    %c0_55 = arith.constant 0 : index
    %151 = vector.load %arg10[%c0_54, %c0_55] : memref<1x32xf32, #tpu.memory_space<vmem>>, vector<1x32xf32>
    %cst_56 = arith.constant dense<0.000000e+00> : vector<8xf32>
    %152 = vector.multi_reduction <add>, %149, %cst_56 [1] : vector<8x32xf32> to vector<8xf32>
    %153 = vector.shape_cast %152 : vector<8xf32> to vector<8x1xf32>
    %cst_57 = arith.constant 3.200000e+01 : f32
    %154 = vector.broadcast %cst_57 : f32 to vector<8x1xf32>
    %155 = arith.divf %153, %154 : vector<8x1xf32>
    %156 = vector.broadcast %155 : vector<8x1xf32> to vector<8x32xf32>
    %157 = arith.subf %149, %156 : vector<8x32xf32>
    %158 = arith.mulf %157, %157 : vector<8x32xf32>
    %cst_58 = arith.constant dense<0.000000e+00> : vector<8xf32>
    %159 = vector.multi_reduction <add>, %158, %cst_58 [1] : vector<8x32xf32> to vector<8xf32>
    %160 = vector.shape_cast %159 : vector<8xf32> to vector<8x1xf32>
    %cst_59 = arith.constant 3.200000e+01 : f32
    %161 = vector.broadcast %cst_59 : f32 to vector<8x1xf32>
    %162 = arith.divf %160, %161 : vector<8x1xf32>
    %163 = vector.broadcast %155 : vector<8x1xf32> to vector<8x32xf32>
    %164 = arith.subf %149, %163 : vector<8x32xf32>
    %cst_60 = arith.constant 1.000000e-07 : f32
    %165 = vector.broadcast %cst_60 : f32 to vector<8x1xf32>
    %166 = arith.addf %162, %165 : vector<8x1xf32>
    %167 = math.rsqrt %166 : vector<8x1xf32>
    %168 = vector.broadcast %167 : vector<8x1xf32> to vector<8x32xf32>
    %169 = arith.mulf %164, %168 : vector<8x32xf32>
    %170 = vector.broadcast %150 : vector<1x32xf32> to vector<8x32xf32>
    %171 = arith.mulf %169, %170 : vector<8x32xf32>
    %172 = vector.broadcast %151 : vector<1x32xf32> to vector<8x32xf32>
    %173 = arith.addf %171, %172 : vector<8x32xf32>
    %c0_61 = arith.constant 0 : index
    %c0_62 = arith.constant 0 : index
    %174 = vector.load %arg11[%c0_61, %c0_62] : memref<32x64xf32, #tpu.memory_space<vmem>>, vector<32x64xf32>
    %cst_63 = arith.constant dense<0.000000e+00> : vector<8x64xf32>
    %175 = tpu.matmul %173, %174, %cst_63 {dimension_numbers = #tpu.dot_dimension_numbers<[1], [0], [0], [1], [0, 0, 1, 1], [], []>} : vector<8x32xf32>, vector<32x64xf32>, vector<8x64xf32> -> vector<8x64xf32>
    %c0_64 = arith.constant 0 : index
    %c0_65 = arith.constant 0 : index
    %176 = vector.load %arg12[%c0_64, %c0_65] : memref<1x64xf32, #tpu.memory_space<vmem>>, vector<1x64xf32>
    %177 = vector.broadcast %176 : vector<1x64xf32> to vector<8x64xf32>
    %178 = arith.addf %175, %177 : vector<8x64xf32>
    %cst_66 = arith.constant 5.000000e-01 : f32
    %179 = vector.broadcast %cst_66 : f32 to vector<8x64xf32>
    %180 = arith.mulf %179, %178 : vector<8x64xf32>
    %181 = arith.mulf %178, %178 : vector<8x64xf32>
    %182 = arith.mulf %178, %181 : vector<8x64xf32>
    %cst_67 = arith.constant 4.471500e-02 : f32
    %183 = vector.broadcast %cst_67 : f32 to vector<8x64xf32>
    %184 = arith.mulf %183, %182 : vector<8x64xf32>
    %185 = arith.addf %178, %184 : vector<8x64xf32>
    %cst_68 = arith.constant 0.797884583 : f32
    %186 = vector.broadcast %cst_68 : f32 to vector<8x64xf32>
    %187 = arith.mulf %186, %185 : vector<8x64xf32>
    %188 = math.tanh %187 : vector<8x64xf32>
    %cst_69 = arith.constant 1.000000e+00 : f32
    %189 = vector.broadcast %cst_69 : f32 to vector<8x64xf32>
    %190 = arith.addf %189, %188 : vector<8x64xf32>
    %191 = arith.mulf %180, %190 : vector<8x64xf32>
    %c0_70 = arith.constant 0 : index
    %c0_71 = arith.constant 0 : index
    %192 = vector.load %arg13[%c0_70, %c0_71] : memref<64x32xf32, #tpu.memory_space<vmem>>, vector<64x32xf32>
    %cst_72 = arith.constant dense<0.000000e+00> : vector<8x32xf32>
    %193 = tpu.matmul %191, %192, %cst_72 {dimension_numbers = #tpu.dot_dimension_numbers<[1], [0], [0], [1], [0, 0, 1, 1], [], []>} : vector<8x64xf32>, vector<64x32xf32>, vector<8x32xf32> -> vector<8x32xf32>
    %c0_73 = arith.constant 0 : index
    %c0_74 = arith.constant 0 : index
    %194 = vector.load %arg14[%c0_73, %c0_74] : memref<1x32xf32, #tpu.memory_space<vmem>>, vector<1x32xf32>
    %195 = vector.broadcast %194 : vector<1x32xf32> to vector<8x32xf32>
    %196 = arith.addf %193, %195 : vector<8x32xf32>
    %197 = arith.addf %196, %173 : vector<8x32xf32>
    %c0_75 = arith.constant 0 : index
    %c0_76 = arith.constant 0 : index
    %198 = vector.load %arg15[%c0_75, %c0_76] : memref<1x32xf32, #tpu.memory_space<vmem>>, vector<1x32xf32>
    %c0_77 = arith.constant 0 : index
    %c0_78 = arith.constant 0 : index
    %199 = vector.load %arg16[%c0_77, %c0_78] : memref<1x32xf32, #tpu.memory_space<vmem>>, vector<1x32xf32>
    %cst_79 = arith.constant dense<0.000000e+00> : vector<8xf32>
    %200 = vector.multi_reduction <add>, %197, %cst_79 [1] : vector<8x32xf32> to vector<8xf32>
    %201 = vector.shape_cast %200 : vector<8xf32> to vector<8x1xf32>
    %cst_80 = arith.constant 3.200000e+01 : f32
    %202 = vector.broadcast %cst_80 : f32 to vector<8x1xf32>
    %203 = arith.divf %201, %202 : vector<8x1xf32>
    %204 = vector.broadcast %203 : vector<8x1xf32> to vector<8x32xf32>
    %205 = arith.subf %197, %204 : vector<8x32xf32>
    %206 = arith.mulf %205, %205 : vector<8x32xf32>
    %cst_81 = arith.constant dense<0.000000e+00> : vector<8xf32>
    %207 = vector.multi_reduction <add>, %206, %cst_81 [1] : vector<8x32xf32> to vector<8xf32>
    %208 = vector.shape_cast %207 : vector<8xf32> to vector<8x1xf32>
    %cst_82 = arith.constant 3.200000e+01 : f32
    %209 = vector.broadcast %cst_82 : f32 to vector<8x1xf32>
    %210 = arith.divf %208, %209 : vector<8x1xf32>
    %211 = vector.broadcast %203 : vector<8x1xf32> to vector<8x32xf32>
    %212 = arith.subf %197, %211 : vector<8x32xf32>
    %cst_83 = arith.constant 1.000000e-07 : f32
    %213 = vector.broadcast %cst_83 : f32 to vector<8x1xf32>
    %214 = arith.addf %210, %213 : vector<8x1xf32>
    %215 = math.rsqrt %214 : vector<8x1xf32>
    %216 = vector.broadcast %215 : vector<8x1xf32> to vector<8x32xf32>
    %217 = arith.mulf %212, %216 : vector<8x32xf32>
    %218 = vector.broadcast %198 : vector<1x32xf32> to vector<8x32xf32>
    %219 = arith.mulf %217, %218 : vector<8x32xf32>
    %220 = vector.broadcast %199 : vector<1x32xf32> to vector<8x32xf32>
    %221 = arith.addf %219, %220 : vector<8x32xf32>
    %c0_84 = arith.constant 0 : index
    %c0_85 = arith.constant 0 : index
    %c0_86 = arith.constant 0 : index
    %222 = vector.load %arg17[%c0_84, %c0_85, %c0_86] : memref<1x8x32xf32, #tpu.memory_space<vmem>>, vector<1x8x32xf32>
    %223 = vector.shape_cast %222 : vector<1x8x32xf32> to vector<8x32xf32>
    %224 = vector.shape_cast %221 : vector<8x32xf32> to vector<1x8x32xf32>
    tpu.vector_store %arg17[%c0_84, %c0_85, %c0_86], %224 {strides = array<i32>} : memref<1x8x32xf32, #tpu.memory_space<vmem>>, vector<1x8x32xf32>,
    return
  }
  func.func @transform_0(%arg0: i32) -> (i32, i32, i32) {
    %c0_i32 = arith.constant 0 : i32
    %c0_i32_0 = arith.constant 0 : i32
    %c0_i32_1 = arith.constant 0 : i32
    return %arg0, %c0_i32, %c0_i32_0 : i32, i32, i32
  }
  func.func @transform_1(%arg0: i32) -> (i32, i32, i32) {
    %c0_i32 = arith.constant 0 : i32
    %c0_i32_0 = arith.constant 0 : i32
    %c0_i32_1 = arith.constant 0 : i32
    return %arg0, %c0_i32, %c0_i32_0 : i32, i32, i32
  }
  func.func @transform_2(%arg0: i32) -> (i32, i32) {
    %c0_i32 = arith.constant 0 : i32
    %c0_i32_0 = arith.constant 0 : i32
    %c0_i32_1 = arith.constant 0 : i32
    return %c0_i32, %c0_i32_0 : i32, i32
  }
  func.func @transform_3(%arg0: i32) -> (i32, i32) {
    %c0_i32 = arith.constant 0 : i32
    %c0_i32_0 = arith.constant 0 : i32
    %c0_i32_1 = arith.constant 0 : i32
    return %c0_i32, %c0_i32_0 : i32, i32
  }
  func.func @transform_4(%arg0: i32) -> (i32, i32) {
    %c0_i32 = arith.constant 0 : i32
    %c0_i32_0 = arith.constant 0 : i32
    %c0_i32_1 = arith.constant 0 : i32
    return %c0_i32, %c0_i32_0 : i32, i32
  }
  func.func @transform_5(%arg0: i32) -> (i32, i32) {
    %c0_i32 = arith.constant 0 : i32
    %c0_i32_0 = arith.constant 0 : i32
    %c0_i32_1 = arith.constant 0 : i32
    return %c0_i32, %c0_i32_0 : i32, i32
  }
  func.func @transform_6(%arg0: i32) -> (i32, i32) {
    %c0_i32 = arith.constant 0 : i32
    %c0_i32_0 = arith.constant 0 : i32
    %c0_i32_1 = arith.constant 0 : i32
    return %c0_i32, %c0_i32_0 : i32, i32
  }
  func.func @transform_7(%arg0: i32) -> (i32, i32) {
    %c0_i32 = arith.constant 0 : i32
    %c0_i32_0 = arith.constant 0 : i32
    %c0_i32_1 = arith.constant 0 : i32
    return %c0_i32, %c0_i32_0 : i32, i32
  }
  func.func @transform_8(%arg0: i32) -> (i32, i32) {
    %c0_i32 = arith.constant 0 : i32
    %c0_i32_0 = arith.constant 0 : i32
    %c0_i32_1 = arith.constant 0 : i32
    return %c0_i32, %c0_i32_0 : i32, i32
  }
  func.func @transform_9(%arg0: i32) -> (i32, i32) {
    %c0_i32 = arith.constant 0 : i32
    %c0_i32_0 = arith.constant 0 : i32
    %c0_i32_1 = arith.constant 0 : i32
    return %c0_i32, %c0_i32_0 : i32, i32
  }
  func.func @transform_10(%arg0: i32) -> (i32, i32) {
    %c0_i32 = arith.constant 0 : i32
    %c0_i32_0 = arith.constant 0 : i32
    %c0_i32_1 = arith.constant 0 : i32
    return %c0_i32, %c0_i32_0 : i32, i32
  }
  func.func @transform_11(%arg0: i32) -> (i32, i32) {
    %c0_i32 = arith.constant 0 : i32
    %c0_i32_0 = arith.constant 0 : i32
    %c0_i32_1 = arith.constant 0 : i32
    return %c0_i32, %c0_i32_0 : i32, i32
  }
  func.func @transform_12(%arg0: i32) -> (i32, i32) {
    %c0_i32 = arith.constant 0 : i32
    %c0_i32_0 = arith.constant 0 : i32
    %c0_i32_1 = arith.constant 0 : i32
    return %c0_i32, %c0_i32_0 : i32, i32
  }
  func.func @transform_13(%arg0: i32) -> (i32, i32) {
    %c0_i32 = arith.constant 0 : i32
    %c0_i32_0 = arith.constant 0 : i32
    %c0_i32_1 = arith.constant 0 : i32
    return %c0_i32, %c0_i32_0 : i32, i32
  }
  func.func @transform_14(%arg0: i32) -> (i32, i32) {
    %c0_i32 = arith.constant 0 : i32
    %c0_i32_0 = arith.constant 0 : i32
    %c0_i32_1 = arith.constant 0 : i32
    return %c0_i32, %c0_i32_0 : i32, i32
  }
  func.func @transform_15(%arg0: i32) -> (i32, i32) {
    %c0_i32 = arith.constant 0 : i32
    %c0_i32_0 = arith.constant 0 : i32
    %c0_i32_1 = arith.constant 0 : i32
    return %c0_i32, %c0_i32_0 : i32, i32
  }
  func.func @transform_16(%arg0: i32) -> (i32, i32, i32) {
    %c0_i32 = arith.constant 0 : i32
    %c0_i32_0 = arith.constant 0 : i32
    %c0_i32_1 = arith.constant 0 : i32
    return %arg0, %c0_i32, %c0_i32_0 : i32, i32, i32
  }
}

</mosaic_0001>

<bundles_post_ra>
// kernel: tpu_custom_call.1
= control target key start
LH: loop header
LB: loop body
LE: loop exit
PB: predicated region body
PF: predicated region fallthrough
CT: control target
= control target key end

     0   :  { %s3967_s0 = inlined_call_operand.hbm [shape: f32[2,8,32], index: 0, kind: input, shape index: {}]   ;;  %s3968_s1 = inlined_call_operand.hbm [shape: f32[2,1,8], index: 1, kind: input, shape index: {}]   ;;  %s3969_s2 = inlined_call_operand.hbm [shape: f32[3,32], index: 2, kind: input, shape index: {}]   ;;  %s3970_s3 = inlined_call_operand.hbm [shape: f32[1,32], index: 3, kind: input, shape index: {}]   ;;  %s3971_s4 = inlined_call_operand.hbm [shape: f32[32,96], index: 4, kind: input, shape index: {}]   ;;  %s3972_s5 = inlined_call_operand.hbm [shape: f32[1,96], index: 5, kind: input, shape index: {}]   ;;  %s3973_s6 = inlined_call_operand.hbm [shape: f32[32,32], index: 6, kind: input, shape index: {}]   ;;  %s3974_s7 = inlined_call_operand.hbm [shape: f32[1,32], index: 7, kind: input, shape index: {}]   ;;  %s3975_s8 = inlined_call_operand.hbm [shape: f32[1,32], index: 8, kind: input, shape index: {}]   ;;  %s3976_s9 = inlined_call_operand.hbm [shape: f32[1,32], index: 9, kind: input, shape index: {}]   ;;  %s3977_s10 = inlined_call_operand.hbm [shape: f32[32,64], index: 10, kind: input, shape index: {}]   ;;  %s3978_s11 = inlined_call_operand.hbm [shape: f32[1,64], index: 11, kind: input, shape index: {}]   ;;  %s3979_s12 = inlined_call_operand.hbm [shape: f32[64,32], index: 12, kind: input, shape index: {}]   ;;  %s3980_s13 = inlined_call_operand.hbm [shape: f32[1,32], index: 13, kind: input, shape index: {}]   ;;  %s3981_s14 = inlined_call_operand.hbm [shape: f32[1,32], index: 14, kind: input, shape index: {}]   ;;  %s3982_s15 = inlined_call_operand.hbm [shape: f32[1,32], index: 15, kind: input, shape index: {}]   ;;  %s3983_s16 = inlined_call_operand.hbm [shape: f32[2,8,32], index: 16, kind: output, shape index: {}]  }
   0x1   :  { %3996 = sst [smem:[#allocation45_spill]] %s3967_s0 }
   0x2   :  { %3997 = sst [smem:[#allocation46_spill]] %s3968_s1 }
   0x3   :  { %3998 = sst [smem:[#allocation47_spill]] %s3969_s2 }
   0x4   :  { %3999 = sst [smem:[#allocation48_spill]] %s3970_s3 }
   0x5   :  { %4000 = sst [smem:[#allocation49_spill]] %s3971_s4 }
   0x6   :  { %4001 = sst [smem:[#allocation50_spill]] %s3972_s5 }
   0x7   :  { %4002 = sst [smem:[#allocation51_spill]] %s3973_s6 }
   0x8   :  { %4003 = sst [smem:[#allocation52_spill]] %s3974_s7 }
   0x9   :  { %4004 = sst [smem:[#allocation53_spill]] %s3983_s16 }
   0xa   :  { %21 = vsyncpa [#allocation4], 0 }
   0xb   :  { %23 = vsyncpa [#allocation4 + $0x1], 0 }
   0xc   :  { %24 = vsyncpa [#allocation7], 0 }
   0xd   :  { %26 = vsyncpa [#allocation7 + $0x1], 0 }
   0xe   :  { %27 = vsyncpa [#allocation10], 0 }
   0xf   :  { %28 = vsyncpa [#allocation13], 0 }
  0x10   :  { %29 = vsyncpa [#allocation16], 0 }
  0x11   :  { %30 = vsyncpa [#allocation19], 0 }
  0x12   :  { %31 = vsyncpa [#allocation22], 0 }
  0x13   :  { %32 = vsyncpa [#allocation25], 0 }
  0x14   :  { %33 = vsyncpa [#allocation28], 0 }
  0x15   :  { %34 = vsyncpa [#allocation5], 0 }
  0x16   :  { %36 = vsyncpa [#allocation5 + $0x1], 0  ;;  %s3293_s21 = smov 0   ;;  %s3295_s22 = smov 0  }
  0x17   :  { %s3297_s23 = smov 0   ;;  %s3299_s24 = smov 0  }
  0x18 LB: > { %4005 = sst [smem:[#allocation41_spill]] %s3157_s21  ;;  %s3171_s25 = smov [#allocation8]   ;;  %s3169_s24 = sphi %s3299_s24, %s4060_s24   ;;  %s3165_s23 = sphi %s3297_s23, %s4059_s23   ;;  %s3161_s22 = sphi %s3295_s22, %s4058_s22   ;;  %s3157_s21 = sphi %s3293_s21, %s4057_s21  }
  0x19   : > { %4006 = sst [smem:[#allocation42_spill]] %s3161_s22  ;;  %s432_s26 = sshll.u32 %s3171_s25, 4  ;;  %s3319_s26 = int_to_ptr.vmem [resolvable:$true] %s432_s26 }
  0x1a   : > { %s3314_s27 = sadd.s32 4294967295, %s3169_s24   ;;  %p2153_p0 = scmp.ge.s32.totalorder %s3169_s24, 1 }
  0x1b   : > { %4007 = sst [smem:[#allocation43_spill]] %s3314_s27  ;;  %p3992_p1 = scmp.eq.s32.totalorder %s3314_s27, 0 }
  0x1c   : > { %p419_p2 = scmp.lt.s32.totalorder %s3169_s24, 3  ;;  %s3172_s29 = smov [#allocation9]  }
  0x1d   : > { %s443_s30 = sshll.u32 %s3172_s29, 4  ;;  %s3173_s0 = smov [#allocation12]   ;;  %s3328_s30 = int_to_ptr.vmem [resolvable:$true] %s443_s30 }
  0x1e   : > { %p3321_p3 = pnand %p2153_p0, %p419_p2  ;;  %s467_s17 = sshll.u32 %s3173_s0, 4  ;;  %s3336_s17 = int_to_ptr.vmem [resolvable:$true] %s467_s17 }
  0x1f   : > { %s3174_s19 = smov [#allocation15]   ;;  %s4011_s2 = sld [smem:[#allocation47_spill]] }
  0x20   : > { %s4008_s28 = scalar_select %p3321_p3, 1, 0 }
  0x21   : > { %p2443_p5 = pneg %p3321_p3  ;;  %s3338_s20 = sshll.u32 %s3174_s19, 4  ;;  %s492_s20 = int_to_ptr.vmem [resolvable:$true] %s3338_s20 }
  0x22   : > { %4009 = sst [smem:[#allocation44_spill]] %s4008_s28 }
  0x23   : > { %p3332_p6 = pnand %p2443_p5, %p3992_p1 }
  0x25   : > { %s2615_s28 = scalar_lea.hbm %s4011_s2, 64  ;;  %p3348_p8 = pneg %p3332_p6 }
  0x26   : > { %p2616_p7 = scmp.ne.s32.totalorder %s4011_s2, %s2615_s28  ;;  %p2622_p11 = scmp.lt.u32.totalorder %s2615_s28, %s4011_s2 }
  0x28   : > { %p2618_p9 = pnand %p3348_p8, %p2616_p7 }
  0x2a   : > { %p2619_p10 = pneg %p2618_p9 }
  0x2c   : > { %p2624_p12 = pnand %p2622_p11, %p2619_p10 }
  0x2e   : > { %2627 = shalt.err (!%p2624_p12)
}
  0x2f   : > { %s2628_s1 = scalar_lea.vmem %s3319_s26, 64  ;;  %p2636_p5 = scmp.lt.s32.totalorder %s3319_s26, %s3319_s26 }
  0x30   : > { %p2629_p13 = scmp.ne.s32.totalorder %s3319_s26, %s2628_s1  ;;  %p2637_p4 = scmp.lt.s32.totalorder %s2628_s1, %s2628_s1 }
  0x32   : > { %p2631_p0 = pnand %p2629_p13, %p3348_p8  ;;  %p2638_p7 = por %p2637_p4, %p2636_p5 }
  0x34   : > { %p2632_p2 = pneg %p2631_p0 }
  0x36   : > { %p2639_p9 = pnand %p2638_p7, %p2632_p2 }
  0x38   : > { %2642 = shalt.err (!%p2639_p9)
}
  0x39   : > { %2446 = dma.hbm_to_vmem [thread:$0]  (!%p3332_p6), %s4011_s2, 64, %s3319_s26, [#allocation7]  }
  0x3a   : > { %s4013_s3 = sld [smem:[#allocation48_spill]] }
  0x40   : > { %s2643_s29 = scalar_lea.hbm %s4013_s3, 16 }
  0x41   : > { %p2644_p10 = scmp.ne.s32.totalorder %s4013_s3, %s2643_s29  ;;  %p2650_p12 = scmp.lt.u32.totalorder %s2643_s29, %s4013_s3 }
  0x43   : > { %p2646_p4 = pnand %p2644_p10, %p3348_p8 }
  0x45   : > { %p2647_p11 = pneg %p2646_p4 }
  0x47   : > { %p2652_p13 = pnand %p2650_p12, %p2647_p11 }
  0x49   : > { %2655 = shalt.err (!%p2652_p13)
}
  0x4a   : > { %s2656_s26 = scalar_lea.vmem %s3328_s30, 16  ;;  %s2663_s21 = scalar_lea.vmem %s3328_s30, 32 }
  0x4b   : > { %p2657_p0 = scmp.ne.s32.totalorder %s3328_s30, %s2656_s26  ;;  %p2664_p7 = scmp.lt.s32.totalorder %s3328_s30, %s3328_s30 }
  0x4c   : > { %p2665_p9 = scmp.lt.s32.totalorder %s2663_s21, %s2656_s26 }
  0x4d   : > { %p2659_p2 = pnand %p2657_p0, %p3348_p8 }
  0x4e   : > { %p2666_p10 = por %p2665_p9, %p2664_p7 }
  0x4f   : > { %p2660_p5 = pneg %p2659_p2 }
  0x51   : > { %p2667_p4 = pnand %p2666_p10, %p2660_p5 }
  0x53   : > { %2670 = shalt.err (!%p2667_p4)
}
  0x54   : > { %2449 = dma.hbm_to_vmem [thread:$0]  (!%p3332_p6), %s4013_s3, 16, %s3328_s30, [#allocation10]  }
  0x55   : > { %s4014_s5 = sld [smem:[#allocation50_spill]] }
  0x5b   : > { %s2671_s25 = scalar_lea.hbm %s4014_s5, 16 }
  0x5c   : > { %p2672_p11 = scmp.ne.s32.totalorder %s4014_s5, %s2671_s25  ;;  %p2678_p0 = scmp.lt.u32.totalorder %s2671_s25, %s4014_s5 }
  0x5e   : > { %p2674_p12 = pnand %p2672_p11, %p3348_p8 }
  0x60   : > { %p2675_p13 = pneg %p2674_p12 }
  0x62   : > { %p2680_p2 = pnand %p2678_p0, %p2675_p13 }
  0x64   : > { %2683 = shalt.err (!%p2680_p2)
}
  0x65   : > { %s2684_s30 = scalar_lea.vmem %s3336_s17, 16  ;;  %s2691_s21 = scalar_lea.vmem %s3336_s17, 32 }
  0x66   : > { %p2685_p5 = scmp.ne.s32.totalorder %s3336_s17, %s2684_s30  ;;  %p2692_p10 = scmp.lt.s32.totalorder %s3336_s17, %s3336_s17 }
  0x67   : > { %p2693_p4 = scmp.lt.s32.totalorder %s2691_s21, %s2684_s30 }
  0x68   : > { %p2687_p7 = pnand %p2685_p5, %p3348_p8 }
  0x69   : > { %p2694_p11 = por %p2693_p4, %p2692_p10 }
  0x6a   : > { %p2688_p9 = pneg %p2687_p7 }
  0x6c   : > { %p2695_p12 = pnand %p2694_p11, %p2688_p9 }
  0x6e   : > { %2698 = shalt.err (!%p2695_p12)
}
  0x6f   : > { %2455 = dma.hbm_to_vmem [thread:$0]  (!%p3332_p6), %s4014_s5, 16, %s3336_s17, [#allocation13]  }
  0x70   : > { %s3175_s27 = smov [#allocation18]   ;;  %s4015_s7 = sld [smem:[#allocation52_spill]] }
  0x71   : > { %s513_s28 = sshll.u32 %s3175_s27, 4  ;;  %s514_s28 = int_to_ptr.vmem [resolvable:$true] %s513_s28 }
  0x76   : > { %s2699_s19 = scalar_lea.hbm %s4015_s7, 16 }
  0x77   : > { %p2700_p13 = scmp.ne.s32.totalorder %s4015_s7, %s2699_s19  ;;  %p2706_p5 = scmp.lt.u32.totalorder %s2699_s19, %s4015_s7 }
  0x79   : > { %p2702_p0 = pnand %p2700_p13, %p3348_p8 }
  0x7b   : > { %p2703_p2 = pneg %p2702_p0 }
  0x7d   : > { %p2708_p7 = pnand %p2706_p5, %p2703_p2 }
  0x7f   : > { %2711 = shalt.err (!%p2708_p7)
}
  0x80   : > { %s2712_s17 = scalar_lea.vmem %s492_s20, 16  ;;  %s2719_s22 = scalar_lea.vmem %s492_s20, 32 }
  0x81   : > { %p2713_p9 = scmp.ne.s32.totalorder %s492_s20, %s2712_s17  ;;  %p2720_p11 = scmp.lt.s32.totalorder %s492_s20, %s492_s20 }
  0x82   : > { %p2721_p12 = scmp.lt.s32.totalorder %s2719_s22, %s2712_s17 }
  0x83   : > { %p2715_p10 = pnand %p2713_p9, %p3348_p8 }
  0x84   : > { %p2722_p1 = por %p2721_p12, %p2720_p11 }
  0x85   : > { %p2716_p4 = pneg %p2715_p10 }
  0x87   : > { %p2723_p3 = pnand %p2722_p1, %p2716_p4 }
  0x89   : > { %2726 = shalt.err (!%p2723_p3)
}
  0x8a   : > { %2461 = dma.hbm_to_vmem [thread:$0]  (!%p3332_p6), %s4015_s7, 16, %s492_s20, [#allocation16]  }
  0x8b   : > { %s2727_s19 = scalar_lea.hbm %s3976_s9, 16 }
  0x8c   : > { %p2728_p13 = scmp.ne.s32.totalorder %s3976_s9, %s2727_s19  ;;  %p2734_p3 = scmp.lt.u32.totalorder %s2727_s19, %s3976_s9 }
  0x8e   : > { %p2730_p0 = pnand %p2728_p13, %p3348_p8 }
  0x90   : > { %p2731_p1 = pneg %p2730_p0 }
  0x92   : > { %p2736_p2 = pnand %p2734_p3, %p2731_p1 }
  0x94   : > { %2739 = shalt.err (!%p2736_p2)
}
  0x95   : > { %s2740_s17 = scalar_lea.vmem %s514_s28, 16  ;;  %s2747_s20 = scalar_lea.vmem %s514_s28, 32 }
  0x96   : > { %p2741_p5 = scmp.ne.s32.totalorder %s514_s28, %s2740_s17  ;;  %p2748_p10 = scmp.lt.s32.totalorder %s514_s28, %s514_s28 }
  0x97   : > { %p2749_p4 = scmp.lt.s32.totalorder %s2747_s20, %s2740_s17 }
  0x98   : > { %p2743_p7 = pnand %p2741_p5, %p3348_p8 }
  0x99   : > { %p2750_p11 = por %p2749_p4, %p2748_p10 }
  0x9a   : > { %p2744_p9 = pneg %p2743_p7 }
  0x9c   : > { %p2751_p12 = pnand %p2750_p11, %p2744_p9 }
  0x9e   : > { %2754 = shalt.err (!%p2751_p12)
}
  0x9f   : > { %2467 = dma.hbm_to_vmem [thread:$0]  (!%p3332_p6), %s3976_s9, 16, %s514_s28, [#allocation19]  }
  0xa0   : > { %s3176_s27 = smov [#allocation21]   ;;  %s3177_s29 = smov [#allocation24]  }
  0xa1   : > { %s537_s25 = sshll.u32 %s3176_s27, 4  ;;  %s561_s19 = sshll.u32 %s3177_s29, 4  ;;  %s538_s25 = int_to_ptr.vmem [resolvable:$true] %s537_s25  ;;  %s562_s19 = int_to_ptr.vmem [resolvable:$true] %s561_s19 }
  0xa2   : > { %s2755_s30 = scalar_lea.hbm %s3978_s11, 16 }
  0xa3   : > { %p2756_p13 = scmp.ne.s32.totalorder %s3978_s11, %s2755_s30  ;;  %p2762_p3 = scmp.lt.u32.totalorder %s2755_s30, %s3978_s11 }
  0xa5   : > { %p2758_p0 = pnand %p2756_p13, %p3348_p8 }
  0xa7   : > { %p2759_p1 = pneg %p2758_p0 }
  0xa9   : > { %p2764_p2 = pnand %p2762_p3, %p2759_p1 }
  0xab   : > { %2767 = shalt.err (!%p2764_p2)
}
  0xac   : > { %s2768_s28 = scalar_lea.vmem %s538_s25, 16  ;;  %s2775_s16 = scalar_lea.vmem %s538_s25, 32 }
  0xad   : > { %p2769_p5 = scmp.ne.s32.totalorder %s538_s25, %s2768_s28  ;;  %p2776_p10 = scmp.lt.s32.totalorder %s538_s25, %s538_s25 }
  0xae   : > { %p2777_p4 = scmp.lt.s32.totalorder %s2775_s16, %s2768_s28 }
  0xaf   : > { %p2771_p7 = pnand %p2769_p5, %p3348_p8 }
  0xb0   : > { %p2778_p11 = por %p2777_p4, %p2776_p10 }
  0xb1   : > { %p2772_p9 = pneg %p2771_p7 }
  0xb3   : > { %p2779_p12 = pnand %p2778_p11, %p2772_p9 }
  0xb5   : > { %2782 = shalt.err (!%p2779_p12)
}
  0xb6   : > { %2473 = dma.hbm_to_vmem [thread:$0]  (!%p3332_p6), %s3978_s11, 16, %s538_s25, [#allocation22]  }
  0xb7   : > { %s2783_s30 = scalar_lea.hbm %s3980_s13, 16 }
  0xb8   : > { %p2784_p13 = scmp.ne.s32.totalorder %s3980_s13, %s2783_s30  ;;  %p2790_p3 = scmp.lt.u32.totalorder %s2783_s30, %s3980_s13 }
  0xba   : > { %p2786_p0 = pnand %p2784_p13, %p3348_p8 }
  0xbc   : > { %p2787_p1 = pneg %p2786_p0 }
  0xbe   : > { %p2792_p2 = pnand %p2790_p3, %p2787_p1 }
  0xc0   : > { %2795 = shalt.err (!%p2792_p2)
}
  0xc1   : > { %s2796_s28 = scalar_lea.vmem %s562_s19, 16  ;;  %s2803_s25 = scalar_lea.vmem %s562_s19, 32 }
  0xc2   : > { %p2797_p5 = scmp.ne.s32.totalorder %s562_s19, %s2796_s28  ;;  %p2804_p10 = scmp.lt.s32.totalorder %s562_s19, %s562_s19 }
  0xc3   : > { %p2805_p4 = scmp.lt.s32.totalorder %s2803_s25, %s2796_s28 }
  0xc4   : > { %p2799_p7 = pnand %p2797_p5, %p3348_p8 }
  0xc5   : > { %p2806_p11 = por %p2805_p4, %p2804_p10 }
  0xc6   : > { %p2800_p9 = pneg %p2799_p7 }
  0xc8   : > { %p2807_p12 = pnand %p2806_p11, %p2800_p9 }
  0xca   : > { %2810 = shalt.err (!%p2807_p12)
}
  0xcb   : > { %2479 = dma.hbm_to_vmem [thread:$0]  (!%p3332_p6), %s3980_s13, 16, %s562_s19, [#allocation25]  }
  0xcc   : > { %s3178_s29 = smov [#allocation11]   ;;  %s4016_s4 = sld [smem:[#allocation49_spill]] }
  0xcd   : > { %s453_s1 = sshll.u32 %s3178_s29, 4  ;;  %s454_s1 = int_to_ptr.vmem [resolvable:$true] %s453_s1 }
  0xd2   : > { %s2811_s21 = scalar_lea.hbm %s4016_s4, 512 }
  0xd3   : > { %p2812_p13 = scmp.ne.s32.totalorder %s4016_s4, %s2811_s21  ;;  %p2818_p3 = scmp.lt.u32.totalorder %s2811_s21, %s4016_s4 }
  0xd5   : > { %p2814_p0 = pnand %p2812_p13, %p3348_p8 }
  0xd7   : > { %p2815_p1 = pneg %p2814_p0 }
  0xd9   : > { %p2820_p2 = pnand %p2818_p3, %p2815_p1 }
  0xdb   : > { %2823 = shalt.err (!%p2820_p2)
}
  0xdc   : > { %s2824_s19 = scalar_lea.vmem %s454_s1, 512  ;;  %p2832_p10 = scmp.lt.s32.totalorder %s454_s1, %s454_s1 }
  0xdd   : > { %p2825_p5 = scmp.ne.s32.totalorder %s454_s1, %s2824_s19  ;;  %p2833_p4 = scmp.lt.s32.totalorder %s2824_s19, %s2824_s19 }
  0xdf   : > { %p2827_p7 = pnand %p2825_p5, %p3348_p8  ;;  %p2834_p11 = por %p2833_p4, %p2832_p10 }
  0xe1   : > { %p2828_p9 = pneg %p2827_p7 }
  0xe3   : > { %p2835_p12 = pnand %p2834_p11, %p2828_p9 }
  0xe5   : > { %2838 = shalt.err (!%p2835_p12)
}
  0xe6   : > { %s3179_s25 = smov 128   ;;  %s3180_s16 = smov 8  }
  0xe7   : > { %2452 = dma.hbm_to_vmem [thread:$0]  (!%p3332_p6), %s4016_s4, 512, %s454_s1, [#allocation10], %s3179_s25, %s3179_s25, %s3180_s16  }
  0xe8   : > { %s3181_s26 = smov [#allocation14]   ;;  %s3182_s21 = smov [#allocation17]  }
  0xe9   : > { %s477_s30 = sshll.u32 %s3181_s26, 4  ;;  %s502_s17 = sshll.u32 %s3182_s21, 4  ;;  %s478_s30 = int_to_ptr.vmem [resolvable:$true] %s477_s30  ;;  %s3511_s17 = int_to_ptr.vmem [resolvable:$true] %s502_s17 }
  0xea   : > { %s4017_s6 = sld [smem:[#allocation51_spill]] }
  0xf0   : > { %s2839_s28 = scalar_lea.hbm %s4017_s6, 512 }
  0xf1   : > { %p2840_p13 = scmp.ne.s32.totalorder %s4017_s6, %s2839_s28  ;;  %p2846_p3 = scmp.lt.u32.totalorder %s2839_s28, %s4017_s6 }
  0xf3   : > { %p2842_p0 = pnand %p2840_p13, %p3348_p8 }
  0xf5   : > { %p2843_p1 = pneg %p2842_p0 }
  0xf7   : > { %p2848_p2 = pnand %p2846_p3, %p2843_p1 }
  0xf9   : > { %2851 = shalt.err (!%p2848_p2)
}
  0xfa   : > { %s2852_s29 = scalar_lea.vmem %s478_s30, 512  ;;  %p2860_p10 = scmp.lt.s32.totalorder %s478_s30, %s478_s30 }
  0xfb   : > { %p2853_p5 = scmp.ne.s32.totalorder %s478_s30, %s2852_s29  ;;  %p2861_p4 = scmp.lt.s32.totalorder %s2852_s29, %s2852_s29 }
  0xfd   : > { %p2855_p7 = pnand %p2853_p5, %p3348_p8  ;;  %p2862_p11 = por %p2861_p4, %p2860_p10 }
  0xff   : > { %p2856_p9 = pneg %p2855_p7 }
 0x101   : > { %p2863_p12 = pnand %p2862_p11, %p2856_p9 }
 0x103   : > { %2866 = shalt.err (!%p2863_p12)
}
 0x104   : > { %2458 = dma.hbm_to_vmem [thread:$0]  (!%p3332_p6), %s4017_s6, 512, %s478_s30, [#allocation13], %s3179_s25, %s3179_s25, %s3180_s16  }
 0x105   : > { %s2867_s22 = scalar_lea.hbm %s3975_s8, 16 }
 0x106   : > { %p2868_p13 = scmp.ne.s32.totalorder %s3975_s8, %s2867_s22  ;;  %p2874_p3 = scmp.lt.u32.totalorder %s2867_s22, %s3975_s8 }
 0x108   : > { %p2870_p0 = pnand %p2868_p13, %p3348_p8 }
 0x10a   : > { %p2871_p1 = pneg %p2870_p0 }
 0x10c   : > { %p2876_p2 = pnand %p2874_p3, %p2871_p1 }
 0x10e   : > { %2879 = shalt.err (!%p2876_p2)
}
 0x10f   : > { %s2880_s30 = scalar_lea.vmem %s3511_s17, 16  ;;  %s2887_s29 = scalar_lea.vmem %s3511_s17, 32 }
 0x110   : > { %p2881_p5 = scmp.ne.s32.totalorder %s3511_s17, %s2880_s30  ;;  %p2888_p10 = scmp.lt.s32.totalorder %s3511_s17, %s3511_s17 }
 0x111   : > { %p2889_p4 = scmp.lt.s32.totalorder %s2887_s29, %s2880_s30 }
 0x112   : > { %p2883_p7 = pnand %p2881_p5, %p3348_p8 }
 0x113   : > { %p2890_p11 = por %p2889_p4, %p2888_p10 }
 0x114   : > { %p2884_p9 = pneg %p2883_p7 }
 0x116   : > { %p2891_p12 = pnand %p2890_p11, %p2884_p9 }
 0x118   : > { %2894 = shalt.err (!%p2891_p12)
}
 0x119   : > { %2464 = dma.hbm_to_vmem [thread:$0]  (!%p3332_p6), %s3975_s8, 16, %s3511_s17, [#allocation16]  }
 0x11a   : > { %s3183_s21 = smov [#allocation20]   ;;  %s3184_s22 = smov [#allocation23]  }
 0x11b   : > { %s523_s20 = sshll.u32 %s3183_s21, 4  ;;  %s547_s28 = sshll.u32 %s3184_s22, 4  ;;  %s524_s20 = int_to_ptr.vmem [resolvable:$true] %s523_s20  ;;  %s3558_s28 = int_to_ptr.vmem [resolvable:$true] %s547_s28 }
 0x11c   : > { %s2895_s1 = scalar_lea.hbm %s3977_s10, 512 }
 0x11d   : > { %p2896_p13 = scmp.ne.s32.totalorder %s3977_s10, %s2895_s1  ;;  %p2902_p3 = scmp.lt.u32.totalorder %s2895_s1, %s3977_s10 }
 0x11f   : > { %p2898_p0 = pnand %p2896_p13, %p3348_p8 }
 0x121   : > { %p2899_p1 = pneg %p2898_p0 }
 0x123   : > { %p2904_p2 = pnand %p2902_p3, %p2899_p1 }
 0x125   : > { %2907 = shalt.err (!%p2904_p2)
}
 0x126   : > { %s2908_s26 = scalar_lea.vmem %s524_s20, 512  ;;  %p2916_p10 = scmp.lt.s32.totalorder %s524_s20, %s524_s20 }
 0x127   : > { %p2909_p5 = scmp.ne.s32.totalorder %s524_s20, %s2908_s26  ;;  %p2917_p4 = scmp.lt.s32.totalorder %s2908_s26, %s2908_s26 }
 0x129   : > { %p2911_p7 = pnand %p2909_p5, %p3348_p8  ;;  %p2918_p11 = por %p2917_p4, %p2916_p10 }
 0x12b   : > { %p2912_p9 = pneg %p2911_p7 }
 0x12d   : > { %p2919_p12 = pnand %p2918_p11, %p2912_p9 }
 0x12f   : > { %2922 = shalt.err (!%p2919_p12)
}
 0x130   : > { %2470 = dma.hbm_to_vmem [thread:$0]  (!%p3332_p6), %s3977_s10, 512, %s524_s20, [#allocation19], %s3179_s25, %s3179_s25, %s3180_s16  }
 0x131   : > { %s2923_s1 = scalar_lea.hbm %s3979_s12, 1024 }
 0x132   : > { %p2924_p13 = scmp.ne.s32.totalorder %s3979_s12, %s2923_s1  ;;  %p2930_p3 = scmp.lt.u32.totalorder %s2923_s1, %s3979_s12 }
 0x134   : > { %p2926_p0 = pnand %p2924_p13, %p3348_p8 }
 0x136   : > { %p2927_p1 = pneg %p2926_p0 }
 0x138   : > { %p2932_p2 = pnand %p2930_p3, %p2927_p1 }
 0x13a   : > { %2935 = shalt.err (!%p2932_p2)
}
 0x13b   : > { %s2936_s20 = scalar_lea.vmem %s3558_s28, 1024  ;;  %p2944_p10 = scmp.lt.s32.totalorder %s3558_s28, %s3558_s28 }
 0x13c   : > { %p2937_p5 = scmp.ne.s32.totalorder %s3558_s28, %s2936_s20  ;;  %p2945_p4 = scmp.lt.s32.totalorder %s2936_s20, %s2936_s20 }
 0x13e   : > { %p2939_p7 = pnand %p2937_p5, %p3348_p8  ;;  %p2946_p11 = por %p2945_p4, %p2944_p10 }
 0x140   : > { %p2940_p9 = pneg %p2939_p7 }
 0x142   : > { %p2947_p12 = pnand %p2946_p11, %p2940_p9 }
 0x144   : > { %2950 = shalt.err (!%p2947_p12)
}
 0x145   : > { %2476 = dma.hbm_to_vmem [thread:$0]  (!%p3332_p6), %s3979_s12, 1024, %s3558_s28, [#allocation22], %s3179_s25, %s3179_s25, %s3180_s16  }
 0x146   : > { %s3185_s22 = smov [#allocation26]   ;;  %s3186_s27 = smov [#allocation27]  }
 0x147   : > { %s572_s19 = sshll.u32 %s3185_s22, 4  ;;  %s583_s1 = sshll.u32 %s3186_s27, 4  ;;  %s573_s19 = int_to_ptr.vmem [resolvable:$true] %s572_s19  ;;  %s3607_s1 = int_to_ptr.vmem [resolvable:$true] %s583_s1 }
 0x148   : > { %s2951_s2 = scalar_lea.hbm %s3981_s14, 16 }
 0x149   : > { %p2952_p13 = scmp.ne.s32.totalorder %s3981_s14, %s2951_s2  ;;  %p2958_p3 = scmp.lt.u32.totalorder %s2951_s2, %s3981_s14 }
 0x14b   : > { %p2954_p0 = pnand %p2952_p13, %p3348_p8 }
 0x14d   : > { %p2955_p1 = pneg %p2954_p0 }
 0x14f   : > { %p2960_p2 = pnand %p2958_p3, %p2955_p1 }
 0x151   : > { %2963 = shalt.err (!%p2960_p2)
}
 0x152   : > { %s2964_s16 = scalar_lea.vmem %s573_s19, 16  ;;  %s2971_s28 = scalar_lea.vmem %s573_s19, 32 }
 0x153   : > { %p2965_p5 = scmp.ne.s32.totalorder %s573_s19, %s2964_s16  ;;  %p2972_p10 = scmp.lt.s32.totalorder %s573_s19, %s573_s19 }
 0x154   : > { %p2973_p4 = scmp.lt.s32.totalorder %s2971_s28, %s2964_s16 }
 0x155   : > { %p2967_p7 = pnand %p2965_p5, %p3348_p8 }
 0x156   : > { %p2974_p11 = por %p2973_p4, %p2972_p10 }
 0x157   : > { %p2968_p9 = pneg %p2967_p7 }
 0x159   : > { %p2975_p12 = pnand %p2974_p11, %p2968_p9 }
 0x15b   : > { %2978 = shalt.err (!%p2975_p12)
}
 0x15c   : > { %2482 = dma.hbm_to_vmem [thread:$0]  (!%p3332_p6), %s3981_s14, 16, %s573_s19, [#allocation25]  }
 0x15d   : > { %s2979_s29 = scalar_lea.hbm %s3982_s15, 16 }
 0x15e   : > { %p2980_p13 = scmp.ne.s32.totalorder %s3982_s15, %s2979_s29  ;;  %p2986_p3 = scmp.lt.u32.totalorder %s2979_s29, %s3982_s15 }
 0x160   : > { %p2982_p0 = pnand %p2980_p13, %p3348_p8 }
 0x162   : > { %p2983_p1 = pneg %p2982_p0 }
 0x164   : > { %p2988_p2 = pnand %p2986_p3, %p2983_p1 }
 0x166   : > { %2991 = shalt.err (!%p2988_p2)
}
 0x167   : > { %s2992_s19 = scalar_lea.vmem %s3607_s1, 16  ;;  %s2999_s25 = scalar_lea.vmem %s3607_s1, 32 }
 0x168   : > { %p2993_p5 = scmp.ne.s32.totalorder %s3607_s1, %s2992_s19  ;;  %p3000_p10 = scmp.lt.s32.totalorder %s3607_s1, %s3607_s1 }
 0x169   : > { %p3001_p4 = scmp.lt.s32.totalorder %s2999_s25, %s2992_s19 }
 0x16a   : > { %p2995_p7 = pnand %p2993_p5, %p3348_p8 }
 0x16b   : > { %p3002_p11 = por %p3001_p4, %p3000_p10 }
 0x16c   : > { %p2996_p9 = pneg %p2995_p7 }
 0x16e   : > { %p3003_p12 = pnand %p3002_p11, %p2996_p9 }
 0x170   : > { %3006 = shalt.err (!%p3003_p12)
}
 0x171   : > { %s4018_s0 = sld [smem:[#allocation42_spill]]  ;;  %s4019_s21 = sld [smem:[#allocation41_spill]] }
 0x172   : > { %s4020_s22 = sld [smem:[#allocation43_spill]]  ;;  %s2152_s18 = sadd.s32 4294967294, %s3169_s24  }
 0x173   : > { %2485 = dma.hbm_to_vmem [thread:$0]  (!%p3332_p6), %s3982_s15, 16, %s3607_s1, [#allocation28]  }
 0x174   : > { %s3653_s27 = sadd.s32 1, %s3169_s24   ;;  %s49_s29 = sadd.s32 1, %s3165_s23 }
 0x175   : > { %s46_s30 = ssub.s32 %s3169_s24, %s3653_s27  ;;  %p57_p0 = scmp.eq.s32.totalorder %s3169_s24, 0 }
 0x176   : > { %p47_p8 = scmp.eq.s32.totalorder %s46_s30, 0  ;;  %p412_p7 = scmp.eq.s32.totalorder %s2152_s18, 1 }
 0x177   : > { %p56_p13 = scmp.ne.s32.totalorder %s3165_s23, %s4018_s0  ;;  %p62_p1 = scmp.ne.s32.totalorder %s4018_s0, %s4019_s21 }
 0x178   : > { %s3664_s2 = scalar_select %p47_p8, %s3165_s23, %s49_s29  }
 0x179   : > { %p3666_p3 = por %p57_p0, %p56_p13  ;;  %p4022_p2 = scmp.eq.s32.totalorder %s4020_s22, 0 }
 0x17a   : > { %p406_p5 = scmp.eq.s32.totalorder %s4020_s22, 1  ;;  %p2511_p9 = scmp.lt.s32.totalorder %s3169_s24, 2 }
 0x17b   : > { %p3672_p6 = por %p4022_p2, %p62_p1  ;;  %s3679_s20 = sand.u32 1, %s3165_s23  }
 0x17c   : > { %p3681_p10 = por %p406_p5, %p56_p13  ;;  %p3685_p4 = por %p412_p7, %p62_p1 }
 0x17d   : > { %s4023_s1 = scalar_select %p3672_p6, 1, 0 }
 0x17e   : > { %s4024_s26 = scalar_select %p3681_p10, 1, 0 }
 0x17f   : > { %s4025_s19 = scalar_select %p3685_p4, 1, 0 }
 0x180   : > { %s2169_s25 = sshll.u32 %s3679_s20, 3  ;;  %s2170_s16 = sshll.u32 %s3169_s24, 7 }
 0x181   : > { %s4026_s21 = sld [smem:[#allocation45_spill]]  ;;  %s598_s18 = scalar_lea.vmem [#allocation3], %s2169_s25 }
 0x182   : > { %s605_s29 = sshll.u32 %s598_s18, 4  ;;  %p3700_p11 = pnand %p2511_p9, %p3666_p3  ;;  %s3696_s29 = int_to_ptr.vmem [resolvable:$true] %s605_s29 }
 0x183   : > { %s595_s5 = scalar_lea.sflag [#allocation4], %s3679_s20 }
 0x184   : > { %p3009_p8 = pneg %p3700_p11 }
 0x187   : > { %s4027_s30 = smov %s4026_s21  ;;  %s3694_s22 = scalar_lea.hbm %s4026_s21, %s2170_s16 }
 0x188   : > { %s3007_s28 = scalar_lea.hbm %s3694_s22, 128  ;;  %s3012_s17 = scalar_lea.hbm %s4027_s30, 256 }
 0x189   : > { %p3008_p12 = scmp.ne.s32.totalorder %s3694_s22, %s3007_s28  ;;  %p3013_p1 = scmp.lt.u32.totalorder %s3694_s22, %s4027_s30 }
 0x18a   : > { %p3014_p3 = scmp.lt.u32.totalorder %s3012_s17, %s3007_s28  ;;  %p3016_p5 = scmp.lt.u32.totalorder %s3007_s28, %s3694_s22 }
 0x18b   : > { %p3010_p13 = pnand %p3009_p8, %p3008_p12 }
 0x18c   : > { %p3015_p2 = por %p3014_p3, %p3013_p1 }
 0x18d   : > { %p3011_p0 = pneg %p3010_p13 }
 0x18e   : > { %p3017_p7 = por %p3016_p5, %p3015_p2 }
 0x190   : > { %p3018_p9 = pnand %p3017_p7, %p3011_p0 }
 0x192   : > { %3021 = shalt.err (!%p3018_p9)
}
 0x193   : > { %s3022_s18 = scalar_lea.vmem %s3696_s29, 128  ;;  %s3187_s25 = smov [#allocation3]  }
 0x194   : > { %p3023_p12 = scmp.ne.s32.totalorder %s3696_s29, %s3022_s18  ;;  %s3027_s16 = sshll.u32 %s3187_s25, 4  ;;  %s3028_s16 = int_to_ptr.vmem [resolvable:$false] %s3027_s16 }
 0x195   : > { %s3029_s0 = scalar_lea.vmem %s3028_s16, 256  ;;  %p3030_p10 = scmp.lt.s32.totalorder %s3696_s29, %s3028_s16 }
 0x196   : > { %p3025_p13 = pnand %p3023_p12, %p3009_p8  ;;  %p3031_p1 = scmp.lt.s32.totalorder %s3029_s0, %s3022_s18 }
 0x198   : > { %p3026_p4 = pneg %p3025_p13  ;;  %p3032_p3 = por %p3031_p1, %p3030_p10 }
 0x19a   : > { %p3033_p2 = pnand %p3032_p3, %p3026_p4 }
 0x19c   : > { %3036 = shalt.err (!%p3033_p2)
}
 0x19d   : > { %2489 = dma.hbm_to_vmem [thread:$0]  (!%p3700_p11), %s3694_s22, 128, %s3696_s29, %s595_s5  }
 0x19e   : > { %s2171_s28 = sshll.u32 %s3169_s24, 4  ;;  %s615_s17 = scalar_lea.vmem [#allocation6], %s3679_s20 }
 0x19f   : > { %s622_s21 = sshll.u32 %s615_s17, 4  ;;  %s4029_s6 = sld [smem:[#allocation46_spill]]  ;;  %s623_s21 = int_to_ptr.vmem [resolvable:$true] %s622_s21 }
 0x1a0   : > { %s4030_s18 = sand.u32 1, %s3169_s24  }
 0x1a1   : > { %s613_s0 = scalar_lea.sflag [#allocation7], %s4030_s18 }
 0x1a5   : > { %s3736_s16 = scalar_lea.hbm %s4029_s6, %s2171_s28  ;;  %s3042_s22 = scalar_lea.hbm %s4029_s6, 32 }
 0x1a6   : > { %s3037_s7 = scalar_lea.hbm %s3736_s16, 16  ;;  %p3043_p5 = scmp.lt.u32.totalorder %s3736_s16, %s4029_s6 }
 0x1a7   : > { %p3038_p10 = scmp.ne.s32.totalorder %s3736_s16, %s3037_s7  ;;  %p3044_p7 = scmp.lt.u32.totalorder %s3042_s22, %s3037_s7 }
 0x1a8   : > { %p3046_p12 = scmp.lt.u32.totalorder %s3037_s7, %s3736_s16 }
 0x1a9   : > { %p3040_p4 = pnand %p3038_p10, %p3009_p8  ;;  %p3045_p9 = por %p3044_p7, %p3043_p5 }
 0x1ab   : > { %p3041_p0 = pneg %p3040_p4  ;;  %p3047_p13 = por %p3046_p12, %p3045_p9 }
 0x1ad   : > { %p3048_p1 = pnand %p3047_p13, %p3041_p0 }
 0x1af   : > { %3051 = shalt.err (!%p3048_p1)
}
 0x1b0   : > { %s3052_s28 = scalar_lea.vmem %s623_s21, 16  ;;  %s3188_s17 = smov [#allocation6]  }
 0x1b1   : > { %p3053_p3 = scmp.ne.s32.totalorder %s623_s21, %s3052_s28  ;;  %s3057_s25 = sshll.u32 %s3188_s17, 4  ;;  %s3058_s25 = int_to_ptr.vmem [resolvable:$false] %s3057_s25 }
 0x1b2   : > { %s3059_s18 = scalar_lea.vmem %s3058_s25, 32  ;;  %p3060_p4 = scmp.lt.s32.totalorder %s623_s21, %s3058_s25 }
 0x1b3   : > { %p3055_p2 = pnand %p3053_p3, %p3009_p8  ;;  %p3061_p6 = scmp.lt.s32.totalorder %s3059_s18, %s3052_s28 }
 0x1b5   : > { %p3056_p10 = pneg %p3055_p2  ;;  %p3062_p5 = por %p3061_p6, %p3060_p4 }
 0x1b7   : > { %p3063_p7 = pnand %p3062_p5, %p3056_p10 }
 0x1b9   : > { %3066 = shalt.err (!%p3063_p7)
}
 0x1ba   : > { %2492 = dma.hbm_to_vmem [thread:$0]  (!%p3700_p11), %s3736_s16, 16, %s623_s21, %s613_s0  }
 0x1bb   : > { %s4031_s7 = sld [smem:[#allocation44_spill]] }
 0x1c1   : > { %p4032_p0 = scmp.ne.s32.totalorder %s4031_s7, 0 }
 0x1c2   : > { %s4033_s5 = sld [smem:[#allocation42_spill]] (!%p4032_p0)  ;;  %p4034_p6 = scmp.ne.s32.totalorder (!%p4032_p0), %s4023_s1, 0 }
 0x1c3   : > { %631 = sbr.rel (%p4032_p0) target bundleno = 3077 (0xc05), region = 84 }
 0x1c8   : > { %s3762_s20 = sand.u32 (!%p4032_p0), 1, %s4033_s5  }
 0x1c9   : > { %s2173_s22 = sshll.u32 (!%p4032_p0), %s3762_s20, 3  ;;  %s634_s4 = scalar_lea.sflag (!%p4032_p0), [#allocation4], %s3762_s20 }
 0x1ca   : > { %s3768_s29 = scalar_lea.vmem [#allocation3], %s2173_s22 }
 0x1cb   : > { %3112 = dma.done.wait (%p4034_p6), %s634_s4, 128  }
 0x1cc   : > { %3114 = vsyncadd (%p4034_p6), %s634_s4, 4294967168  ;;  %s4035_s3 = sld [smem:[#allocation43_spill]]  ;;  %s645_s0 = scalar_lea.vmem [#allocation6], %s3762_s20 }
 0x1d2   : > { %s642_s21 = sand.u32 1, %s4035_s3  }
 0x1d3   : > { %s643_s16 = scalar_lea.sflag [#allocation7], %s642_s21 }
 0x1d4   : > { %3116 = dma.done.wait (%p4034_p6), %s643_s16, 16  }
 0x1d5   : > { %3118 = vsyncadd (%p4034_p6), %s643_s16, 4294967280  ;;  %p4036_p11 = scmp.eq.s32.totalorder %s4035_s3, 0 }
 0x1d7   : > { %3120 = dma.done.wait (%p4036_p11), [#allocation7], 64   ;;  %p4037_p8 = pmov %p4036_p11 }
 0x1d9   : > { %3122 = vsyncadd (%p4037_p8), [#allocation7], 4294967232  ;;  %p4038_p9 = pmov %p4037_p8 }
 0x1da   : > { %p4039_p12 = pmov %p4037_p8 }
 0x1db   : > { %3124 = dma.done.wait (%p4038_p9), [#allocation10], 528  }
 0x1dc   : > { %3126 = vsyncadd (%p4039_p12), [#allocation10], 4294966768  ;;  %p4040_p13 = pmov %p4037_p8 }
 0x1dd   : > { %p4041_p1 = pmov %p4037_p8 }
 0x1de   : > { %3128 = dma.done.wait (%p4040_p13), [#allocation13], 528  }
 0x1df   : > { %3130 = vsyncadd (%p4041_p1), [#allocation13], 4294966768  ;;  %p4042_p3 = pmov %p4041_p1 }
 0x1e0   : > { %p4043_p2 = pmov %p4041_p1 }
 0x1e1   : > { %3132 = dma.done.wait (%p4042_p3), [#allocation16], 32  }
 0x1e2   : > { %3134 = vsyncadd (%p4043_p2), [#allocation16], 4294967264  ;;  %p4044_p10 = pmov %p4041_p1 }
 0x1e3   : > { %p4045_p4 = pmov %p4041_p1 }
 0x1e4   : > { %3136 = dma.done.wait (%p4044_p10), [#allocation19], 528  }
 0x1e5   : > { %3138 = vsyncadd (%p4045_p4), [#allocation19], 4294966768  ;;  %p4046_p5 = pmov %p4041_p1 }
 0x1e6   : > { %p4047_p7 = pmov %p4041_p1 }
 0x1e7   : > { %3140 = dma.done.wait (%p4046_p5), [#allocation22], 1040  }
 0x1e8   : > { %3142 = vsyncadd (%p4047_p7), [#allocation22], 4294966256  ;;  %p4048_p0 = pmov %p4041_p1 }
 0x1ea   : > { %3144 = dma.done.wait (%p4048_p0), [#allocation25], 32   ;;  %p4049_p6 = pmov %p4048_p0 }
 0x1eb   : > { %p4050_p11 = pmov %p4048_p0 }
 0x1ec   : > { %3146 = vsyncadd (%p4049_p6), [#allocation25], 4294967264 }
 0x1ed   : > { %3148 = dma.done.wait (%p4050_p11), [#allocation28], 16   ;;  %p4051_p8 = pmov %p4048_p0 }
 0x1ee   : > { %v756_v0 = vlaneseq  ;;  %v3189_v1 = vmov 0.0|0.0   ;;  %vm3190_vm0 = vmmov 0   ;;  %v3191_v2 = vmov 0.0   ;;  %v801_v9 = vld [vmem:[#allocation11] sm:$0xff]  ;;  %v802_v10 = vld [vmem:[#allocation11 + $0x8] sm:$0xff]  ;;  %v803_v11 = vld [vmem:[#allocation11 + $0x10] sm:$0xff] }
 0x1ef   : > { %3150 = vsyncadd (%p4051_p8), [#allocation28], 4294967280  ;;  %2351 = vmatprep.subr.bf16.mxu1 %v3189_v1  ;;  %2267 = vmatprep.mubr.msk.f32.mxu1 %vm3190_vm0, %v3191_v2  ;;  %v2352_v12 = vpack.c.bf16 %v802_v10, %v801_v9  ;;  %v804_v13 = vld [vmem:[#allocation11 + $0x18] sm:$0xff]  ;;  %v754_v14 = vld [vmem:[%s3768_s29] sm:$0xff]  ;;  %vm812_vm3 = vcmask 261120   ;;  %s3192_s1 = smov 120  }
 0x1f0   : > { %v757_v3 = vshrl.u32 %v756_v0, 7  ;;  %2280 = vmatprep.subr.mxu0 %v3191_v2  ;;  %2282 = vmatprep.mubr.msk.f32.mxu0 %vm3190_vm0, %v3191_v2  ;;  %v755_v15 = vld [vmem:[#allocation8] sm:$0x7]  ;;  %v758_v16 = vrot.slane %v754_v14, 7  ;;  %v2355_v19 = vpack.c.bf16 %v804_v13, %v803_v11  ;;  %v778_v20 = vrot.slane %v754_v14, 1  ;;  %s3193_s28 = smov 96  }
 0x1f1   : > { %2353 = vmatpush3.bf16.msra.mxu1 %v2352_v12  ;;  %v2189_v29 = vld [vmem:[#allocation9] ss:$0 sm:$0xff]  ;;  %v2190_v32 = vld [vmem:[#allocation12] ss:$0 sm:$0xff]  ;;  %s3194_s17 = smov 80   ;;  %s3195_s25 = smov 88  }
 0x1f2   : > { %v759_v4 = vadd.s32 4294967295, %v757_v3  ;;  %v3818_v5 = vsub.s32 0, %v757_v3  ;;  %v774_v6 = vsub.s32 1, %v757_v3  ;;  %v779_v7 = vadd.s32 1, %v757_v3  ;;  %2354 = vmatprep.subr.bf16.mxu1 %v3189_v1  ;;  %s3196_s18 = smov 72   ;;  %s3197_s7 = smov 112  }
 0x1f3   : > { %v788_v8 = vsub.s32 2, %v757_v3  ;;  %s3198_s5 = smov 104   ;;  %vm900_vm4 = vcmask 64512   ;;  %v3862_v43 = vld [vmem:[%s645_s0] sm:$0x1]  ;;  %s3200_s4 = smov 56  }
 0x1f4   : > { %vm760_vm1 = vcmp.ge.s32.totalorder %v759_v4, 0  ;;  %v769_v17 = vrot.slane %v755_v15, %v3818_v5  ;;  %v775_v18 = vrot.slane %v755_v15, %v774_v6  ;;  %vm781_vm2 = vcmp.lt.s32.totalorder %v779_v7, 8  ;;  %s3201_s29 = smov 64   ;;  %s3202_s21 = smov 40  }
 0x1f5   : > { %v789_v21 = vrot.slane %v755_v15, %v788_v8  ;;  %v765_v22 = vsel %vm760_vm1, %v758_v16, 0.0  ;;  %v785_v25 = vsel %vm781_vm2, %v778_v20, 0.0  ;;  %2356 = vmatpush3.bf16.msra.mxu1 %v2355_v19  ;;  %vm887_vm5 = vcmp.gt.f32.partialorder %v3862_v43, 0.0  ;;  %s3203_s16 = smov 48   ;;  %s3204_s0 = smov 8  }
 0x1f6   : > { %v776_v23 = vmul.f32 %v775_v18, %v754_v14  ;;  %v770_v24 = vmul.f32 %v769_v17, %v765_v22  ;;  %2270 = vmatprep.subr.mxu1 %v3191_v2  ;;  %v3199_v44 = vmov -3.4028235e+38   ;;  %vm1240_vm6 = vcmask 130112   ;;  %p4053_p12 = scmp.ne.s32.totalorder %s4024_s26, 0 }
 0x1f7   : > { %v790_v26 = vmul.f32 %v789_v21, %v785_v25  ;;  %v888_v45 = vsel %vm887_vm5, 0.0, %v3199_v44  ;;  %vm1412_vm7 = vcmask 195712   ;;  %vm1584_vm8 = vcmask 261312  }
 0x1f8   : > { %v777_v27 = vadd.f32 %v776_v23, %v770_v24  ;;  %v895_v46 = vrot.slane %v888_v45, %v3818_v5  ;;  %v2192_v24 = vsel %vm887_vm5, 1.0, %v3191_v2  ;;  %vm1810_vm9 = vcmask 523264  }
 0x1fa   : > { %v791_v28 = vadd.f32 %v790_v26, %v777_v27  ;;  %v990_v26 = vrot.slane %v2192_v24, %v3818_v5 }
 0x1fc   : > { %v792_v30 = vadd.f32 %v791_v28, %v754_v14 }
 0x1fe   : > { %v3824_v31 = vadd.f32 %v2189_v29, %v792_v30 }
 0x200   : > { %2268 = vmatmul.mubr.msk.f32.vlgmr.msra.gmra.mrb[0].mxu1 %vm812_vm3, %v3824_v31 }
 0x201   : > { %2272 = vmatprep.mubr.msk.f32.mxu1 %vm3190_vm0, %v3191_v2 }
 0x2d3   : > { %v882_v33 = vpop.f32.mrb[0].mxu1 }
 0x2d4   : > { %v3830_v34 = vadd.f32 %v2190_v32, %v882_v33  ;;  %v2269_v35 = vpop.f32.mrb[1].mxu1 }
 0x2d6   : > { %1070 = vrot.lane.b32.xlu1 %v3830_v34, %s3192_s1  ;;  %898 = vrot.lane.b32.xlu0 %v3830_v34, %s3193_s28  ;;  %s3205_s1 = smov 16   ;;  %s3206_s28 = smov 24  }
 0x2da   : > { %1244 = vrot.lane.b32.xlu1 %v3830_v34, %s3194_s17  ;;  %1072 = vrot.lane.b32.xlu0 %v3830_v34, %s3195_s25  ;;  %s2216_s17 = sshll.u32 %s4035_s3, 7  ;;  %s753_s25 = scalar_lea.vmem [#allocation29], %s2173_s22 }
 0x2db   : > { %s3207_s22 = smov [#allocation29]  }
 0x2dc   : > { %s3071_s3 = sshll.u32 %s3207_s22, 4  ;;  %s3072_s3 = int_to_ptr.vmem [resolvable:$false] %s3071_s3 }
 0x2de   : > { %1416 = vrot.lane.b32.xlu1 %v3830_v34, %s3196_s18  ;;  %1242 = vrot.lane.b32.xlu0 %v3830_v34, %s3197_s7  ;;  %s1929_s18 = sshll.u32 %s753_s25, 4  ;;  %s3924_s18 = int_to_ptr.vmem [resolvable:$true] %s1929_s18 }
 0x2df   : > { %p3074_p3 = scmp.lt.s32.totalorder %s3924_s18, %s3072_s3 }
 0x2e2   : > { %1414 = vrot.lane.b32.xlu0 %v3830_v34, %s3198_s5 }
 0x348   : > { %v1071_v36 = vpop.permute.xlu1 %1070  ;;  %v899_v37 = vpop.permute.xlu0 %898 }
 0x349   : > { %2271 = vmatpush3.xpose.msk.msra.mxu1 %vm900_vm4, %v899_v37 }
 0x34a   : > { %2275 = vmatprep.subr.mxu1 %v3191_v2 }
 0x34c   : > { %2273 = vmatmul.mubr.msk.f32.vlgmr.msra.gmra.mrb[2].mxu1 %vm900_vm4, %v3830_v34  ;;  %v1073_v38 = vpop.permute.xlu0 %1072  ;;  %v1245_v39 = vpop.permute.xlu1 %1244 }
 0x34d   : > { %2281 = vmatpush3.xpose.msk.msra.mxu0 %vm900_vm4, %v1073_v38  ;;  %2277 = vmatprep.mubr.msk.f32.mxu1 %vm3190_vm0, %v3191_v2 }
 0x34e   : > { %2290 = vmatprep.subr.mxu0 %v3191_v2 }
 0x350   : > { %2283 = vmatmul.mubr.msk.f32.vlgmr.msra.gmra.mrb[0].mxu0 %vm900_vm4, %v1071_v36  ;;  %v1243_v40 = vpop.permute.xlu0 %1242  ;;  %v1417_v41 = vpop.permute.xlu1 %1416 }
 0x351   : > { %2291 = vmatpush3.xpose.msk.msra.mxu0 %vm900_vm4, %v1245_v39  ;;  %2292 = vmatprep.mubr.msk.f32.mxu0 %vm3190_vm0, %v3191_v2 }
 0x352   : > { %2300 = vmatprep.subr.mxu0 %v3191_v2 }
 0x354   : > { %2293 = vmatmul.mubr.msk.f32.vlgmr.msra.gmra.mrb[2].mxu0 %vm900_vm4, %v1243_v40  ;;  %v1415_v42 = vpop.permute.xlu0 %1414 }
 0x355   : > { %2301 = vmatpush3.xpose.msk.msra.mxu0 %vm900_vm4, %v1417_v41  ;;  %2302 = vmatprep.mubr.msk.f32.mxu0 %vm3190_vm0, %v3191_v2 }
 0x356   : > { %2357 = vmatprep.subr.bf16.mxu0 %v3189_v1 }
 0x358   : > { %2303 = vmatmul.mubr.msk.f32.vlgmr.msra.gmra.mrb[4].mxu0 %vm900_vm4, %v1415_v42 }
 0x359   : > { %2318 = vmatprep.mubr.msk.f32.mxu0 %vm3190_vm0, %v3191_v2 }
 0x41f   : > { %v971_v47 = vpop.f32.mrb[2].mxu1 }
 0x420   : > { %v972_v48 = vadd.f32 %v971_v47, %v895_v46  ;;  %v2274_v49 = vpop.f32.mrb[3].mxu1 }
 0x421   : > { %v1588_v49 = vld [vmem:[#allocation14 + $0x8] sm:$0xff] }
 0x422   : > { %v975_v50 = vsel %vm900_vm4, %v972_v48, -inf }
 0x423   : > { %v1144_v51 = vpop.f32.mrb[0].mxu0  ;;  %976 = vmax.xlane.f32.xlu1 %v975_v50 }
 0x424   : > { %v1145_v52 = vadd.f32 %v1144_v51, %v895_v46  ;;  %v2284_v53 = vpop.f32.mrb[1].mxu0  ;;  %v1589_v51 = vld [vmem:[#allocation14 + $0x10] sm:$0xff] }
 0x426   : > { %v1148_v54 = vsel %vm900_vm4, %v1145_v52, -inf }
 0x427   : > { %1149 = vmax.xlane.f32.xlu0 %v1148_v54  ;;  %v1316_v55 = vpop.f32.mrb[2].mxu0 }
 0x428   : > { %v1317_v56 = vadd.f32 %v1316_v55, %v895_v46  ;;  %v2294_v57 = vpop.f32.mrb[3].mxu0 }
 0x42a   : > { %v1320_v58 = vsel %vm900_vm4, %v1317_v56, -inf }
 0x42b   : > { %1321 = vmax.xlane.f32.xlu0 %v1320_v58  ;;  %v1488_v59 = vpop.f32.mrb[4].mxu0 }
 0x42c   : > { %v1489_v60 = vadd.f32 %v1488_v59, %v895_v46  ;;  %v2304_v61 = vpop.f32.mrb[5].mxu0 }
 0x42e   : > { %v1492_v62 = vsel %vm900_vm4, %v1489_v60, -inf }
 0x42f   : > { %1493 = vmax.xlane.f32.xlu1 %v1492_v62  ;;  %v2205_v62 = vld [vmem:[#allocation15] ss:$0 sm:$0xff] }
 0x4b0   : > { %v977_v63 = vpop.xlane.xlu1 %976 }
 0x4b1   : > { %v978_v0 = vsub.f32 %v972_v48, %v977_v63  ;;  %v1587_v48 = vld [vmem:[#allocation14] sm:$0xff] }
 0x4b2   : > { %v2358_v50 = vpack.c.bf16 %v1588_v49, %v1587_v48 }
 0x4b3   : > { %v979_v3 = vmul.f32 1.442695, %v978_v0 }
 0x4b4   : > { %v1150_v4 = vpop.xlane.xlu0 %1149  ;;  %2359 = vmatpush3.bf16.msra.mxu0 %v2358_v50 }
 0x4b5   : > { %2593 = vpow2.f32 %v979_v3  ;;  %v1151_v6 = vsub.f32 %v1145_v52, %v1150_v4  ;;  %v1590_v52 = vld [vmem:[#allocation14 + $0x18] sm:$0xff]  ;;  %2360 = vmatprep.subr.bf16.mxu0 %v3189_v1 }
 0x4b6   : > { %v2361_v54 = vpack.c.bf16 %v1590_v52, %v1589_v51 }
 0x4b7   : > { %v1152_v7 = vmul.f32 1.442695, %v1151_v6 }
 0x4b8   : > { %v1322_v8 = vpop.xlane.xlu0 %1321  ;;  %2362 = vmatpush3.bf16.msra.mxu0 %v2361_v54 }
 0x4b9   : > { %2595 = vpow2.f32 %v1152_v7  ;;  %v1323_v9 = vsub.f32 %v1317_v56, %v1322_v8  ;;  %2369 = vmatprep.subr.bf16.mxu0 %v3189_v1 }
 0x4bb   : > { %v1324_v10 = vmul.f32 1.442695, %v1323_v9 }
 0x4bc   : > { %v1494_v17 = vpop.xlane.xlu1 %1493 }
 0x4bd   : > { %2597 = vpow2.f32 %v1324_v10  ;;  %v1495_v18 = vsub.f32 %v1489_v60, %v1494_v17 }
 0x4bf   : > { %v2594_v11 = vpop.eup %2593  ;;  %v1496_v19 = vmul.f32 1.442695, %v1495_v18 }
 0x4c0   : > { %v981_v12 = vsel %vm900_vm4, %v2594_v11, 0.0 }
 0x4c1   : > { %982 = vadd.xlane.f32.xlu0 %v981_v12  ;;  %2599 = vpow2.f32 %v1496_v19  ;;  %v1702_v12 = vld [vmem:[#allocation20] sm:$0xff] }
 0x4c3   : > { %v2596_v13 = vpop.eup %2595 }
 0x4c4   : > { %v1154_v14 = vsel %vm900_vm4, %v2596_v13, 0.0 }
 0x4c5   : > { %1155 = vadd.xlane.f32.xlu1 %v1154_v14 }
 0x4c7   : > { %v2598_v15 = vpop.eup %2597 }
 0x4c8   : > { %v1326_v16 = vsel %vm900_vm4, %v2598_v15, 0.0 }
 0x4c9   : > { %1327 = vadd.xlane.f32.xlu0 %v1326_v16 }
 0x4cb   : > { %v2600_v20 = vpop.eup %2599 }
 0x4cc   : > { %v1498_v21 = vsel %vm900_vm4, %v2600_v20, 0.0 }
 0x4d6   : > { %1160 = vrot.lane.b32.xlu1 %v3830_v34, %s3200_s4  ;;  %s4052_s4 = sld [smem:[#allocation53_spill]] }
 0x4df   : > { %993 = vrot.lane.b32.xlu0 %v3830_v34, %s3201_s29  ;;  %s3922_s29 = scalar_lea.hbm %s4052_s4, %s2216_s17 }
 0x4e3   : > { %1504 = vrot.lane.b32.xlu0 %v3830_v34, %s3202_s21  ;;  %s1916_s21 = scalar_lea.sflag [#allocation5], %s3762_s20 }
 0x4fa   : > { %1499 = vadd.xlane.f32.xlu1 %v1498_v21 }
 0x50b   : > { %1332 = vrot.lane.b32.xlu1 %v3830_v34, %s3203_s16  ;;  %s3067_s16 = scalar_lea.vmem %s3924_s18, 128 }
 0x50c   : > { %p3068_p9 = scmp.ne.s32.totalorder %s3924_s18, %s3067_s16 }
 0x50e   : > { %p3069_p13 = pnand %p3068_p9, %p4053_p12 }
 0x510   : > { %p3070_p1 = pneg %p3069_p13 }
 0x54e   : > { %v983_v22 = vpop.xlane.xlu0 %982 }
 0x54f   : > { %2601 = vrcp.f32 %v983_v22  ;;  %v2208_v22 = vld [vmem:[#allocation18] ss:$0 sm:$0xff] }
 0x552   : > { %v1156_v23 = vpop.xlane.xlu1 %1155 }
 0x553   : > { %2603 = vrcp.f32 %v1156_v23 }
 0x556   : > { %v1328_v25 = vpop.xlane.xlu0 %1327  ;;  %v1161_v34 = vpop.permute.xlu1 %1160 }
 0x557   : > { %2605 = vrcp.f32 %v1328_v25  ;;  %v1795_v25 = vld [vmem:[#allocation23] sm:$0xff] }
 0x559   : > { %v2602_v27 = vpop.eup %2601 }
 0x55a   : > { %v985_v28 = vmul.f32 %v2602_v27, %v2594_v11  ;;  %v994_v29 = vpop.permute.xlu0 %993 }
 0x55b   : > { %2276 = vmatpush3.msra.mxu1 %v994_v29  ;;  %v1798_v29 = vld [vmem:[#allocation23 + $0x18] sm:$0xff] }
 0x55c   : > { %2285 = vmatprep.subr.mxu1 %v3191_v2  ;;  %v992_v30 = vmul.f32 %v990_v26, %v985_v28  ;;  %v1797_v28 = vld [vmem:[#allocation23 + $0x10] sm:$0xff] }
 0x55d   : > { %v2604_v32 = vpop.eup %2603 }
 0x55e   : > { %v1158_v33 = vmul.f32 %v2604_v32, %v2596_v13  ;;  %2278 = vmatmul.mubr.msk.f32.vlgmr.msra.gmra.mrb[4].mxu1 %vm900_vm4, %v992_v30  ;;  %v1505_v40 = vpop.permute.xlu0 %1504  ;;  %v1703_v13 = vld [vmem:[#allocation20 + $0x8] sm:$0xff]  ;;  %v2373_v30 = vpack.c.bf16 %v1798_v29, %v1797_v28 }
 0x55f   : > { %2286 = vmatpush3.msra.mxu1 %v1161_v34  ;;  %2287 = vmatprep.mubr.msk.f32.mxu1 %vm3190_vm0, %v3191_v2  ;;  %v2364_v14 = vpack.c.bf16 %v1703_v13, %v1702_v12  ;;  %v1799_v32 = vld [vmem:[#allocation23 + $0x20] sm:$0xff] }
 0x560   : > { %v1159_v35 = vmul.f32 %v1158_v33, %v990_v26  ;;  %2295 = vmatprep.subr.mxu1 %v3191_v2  ;;  %v1800_v33 = vld [vmem:[#allocation23 + $0x28] sm:$0xff] }
 0x561   : > { %v2606_v5 = vpop.eup %2605  ;;  %v2376_v34 = vpack.c.bf16 %v1800_v33, %v1799_v32 }
 0x562   : > { %2288 = vmatmul.mubr.msk.f32.vlgmr.msra.gmra.mrb[6].mxu1 %vm900_vm4, %v1159_v35  ;;  %v1330_v36 = vmul.f32 %v2606_v5, %v2598_v15  ;;  %v1705_v15 = vld [vmem:[#allocation20 + $0x18] sm:$0xff] }
 0x563   : > { %2297 = vmatprep.mubr.msk.f32.mxu1 %vm3190_vm0, %v3191_v2  ;;  %v1801_v35 = vld [vmem:[#allocation23 + $0x30] sm:$0xff]  ;;  %v1802_v5 = vld [vmem:[#allocation23 + $0x38] sm:$0xff] }
 0x564   : > { %v1331_v39 = vmul.f32 %v1330_v36, %v990_v26  ;;  %v2379_v36 = vpack.c.bf16 %v1802_v5, %v1801_v35 }
 0x587   : > { %v1500_v37 = vpop.xlane.xlu1 %1499 }
 0x588   : > { %2607 = vrcp.f32 %v1500_v37  ;;  %v2209_v37 = vld [vmem:[#allocation21] ss:$0 sm:$0xff] }
 0x58b   : > { %v1333_v38 = vpop.permute.xlu1 %1332 }
 0x58c   : > { %2296 = vmatpush3.msra.mxu1 %v1333_v38 }
 0x58d   : > { %2298 = vmatmul.mubr.msk.f32.vlgmr.msra.gmra.mrb[8].mxu1 %vm900_vm4, %v1331_v39  ;;  %2305 = vmatprep.subr.mxu1 %v3191_v2 }
 0x58e   : > { %2306 = vmatpush3.msra.mxu1 %v1505_v40  ;;  %2307 = vmatprep.mubr.msk.f32.mxu1 %vm3190_vm0, %v3191_v2 }
 0x58f   : > { %2363 = vmatprep.subr.bf16.mxu1 %v3189_v1 }
 0x592   : > { %v2608_v41 = vpop.eup %2607 }
 0x593   : > { %v1502_v42 = vmul.f32 %v2608_v41, %v2600_v20  ;;  %v2207_v20 = vld [vmem:[#allocation17] ss:$0 sm:$0xff] }
 0x595   : > { %v1503_v43 = vmul.f32 %v1502_v42, %v990_v26  ;;  %v1796_v26 = vld [vmem:[#allocation23 + $0x8] sm:$0xff] }
 0x596   : > { %v2370_v27 = vpack.c.bf16 %v1796_v26, %v1795_v25 }
 0x597   : > { %2308 = vmatmul.mubr.msk.f32.vlgmr.msra.gmra.mrb[10].mxu1 %vm900_vm4, %v1503_v43 }
 0x598   : > { %2329 = vmatprep.mubr.msk.f32.mxu1 %vm3190_vm0, %v3191_v2  ;;  %2365 = vmatpush3.bf16.msra.mxu1 %v2364_v14 }
 0x599   : > { %2366 = vmatprep.subr.bf16.mxu1 %v3189_v1 }
 0x631   : > { %v1065_v44 = vpop.f32.mrb[4].mxu1 }
 0x632   : > { %1069 = vst.msk [vmem:[#allocation2] sm:$0xff] %vm900_vm4, %v1065_v44  ;;  %v2279_v45 = vpop.f32.mrb[5].mxu1 }
 0x635   : > { %v1232_v46 = vpop.f32.mrb[6].mxu1 }
 0x636   : > { %1237 = vrot.lane.b32.xlu1 %v1232_v46, %s3204_s0  ;;  %v2289_v47 = vpop.f32.mrb[7].mxu1  ;;  %s3073_s0 = scalar_lea.vmem %s3072_s3, 256 }
 0x637   : > { %p3075_p2 = scmp.lt.s32.totalorder %s3073_s0, %s3067_s16 }
 0x639   : > { %p3076_p10 = por %p3075_p2, %p3074_p3 }
 0x63b   : > { %p3077_p4 = pnand %p3076_p10, %p3070_p1 }
 0x660   : > { %v1404_v53 = vpop.f32.mrb[8].mxu1 }
 0x661   : > { %1409 = vrot.lane.b32.xlu0 %v1404_v53, %s3205_s1  ;;  %v2299_v55 = vpop.f32.mrb[9].mxu1 }
 0x66a   : > { %v1576_v56 = vpop.f32.mrb[10].mxu1 }
 0x66b   : > { %1581 = vrot.lane.b32.xlu1 %v1576_v56, %s3206_s28  ;;  %v2309_v57 = vpop.f32.mrb[11].mxu1 }
 0x6a8   : > { %v1238_v58 = vpop.permute.xlu1 %1237 }
 0x6a9   : > { %1241 = vst.msk [vmem:[#allocation2] sm:$0xff] %vm1240_vm6, %v1238_v58 }
 0x6d3   : > { %v1410_v59 = vpop.permute.xlu0 %1409 }
 0x6d4   : > { %1413 = vst.msk [vmem:[#allocation2] sm:$0xff] %vm1412_vm7, %v1410_v59 }
 0x6dd   : > { %v1582_v60 = vpop.permute.xlu1 %1581 }
 0x6de   : > { %1585 = vst.msk [vmem:[#allocation2] sm:$0xff] %vm1584_vm8, %v1582_v60 }
 0x6e5   : > { %v1586_v61 = vld [vmem:[#allocation2] sm:$0xff] }
 0x6e6   : > { %2319 = vmatmul.mubr.msk.f32.vlgmr.msra.gmra.mrb[6].mxu0 %vm812_vm3, %v1586_v61 }
 0x6e7   : > { %2348 = vmatprep.mubr.msk.f32.mxu0 %vm3190_vm0, %v3191_v2  ;;  %v1704_v2 = vld [vmem:[#allocation20 + $0x10] sm:$0xff]  ;;  %2371 = vmatpush3.bf16.msra.mxu0 %v2370_v27 }
 0x6e8   : > { %v2367_v16 = vpack.c.bf16 %v1705_v15, %v1704_v2  ;;  %2372 = vmatprep.subr.bf16.mxu0 %v3189_v1 }
 0x6ea   : > { %2368 = vmatpush3.bf16.msra.mxu1 %v2367_v16 }
 0x6eb   : > { %2374 = vmatpush3.bf16.msra.mxu0 %v2373_v30 }
 0x6ec   : > { %2375 = vmatprep.subr.bf16.mxu0 %v3189_v1 }
 0x6ef   : > { %2377 = vmatpush3.bf16.msra.mxu0 %v2376_v34 }
 0x6f0   : > { %2378 = vmatprep.subr.bf16.mxu0 %v3189_v1  ;;  %v2211_v1 = vld [vmem:[#allocation24] ss:$0 sm:$0xff] }
 0x6f3   : > { %2380 = vmatpush3.bf16.msra.mxu0 %v2379_v36 }
 0x7b9   : > { %v1667_v63 = vpop.f32.mrb[6].mxu0 }
 0x7ba   : > { %v1668_v0 = vadd.f32 %v2205_v62, %v1667_v63  ;;  %v2320_v3 = vpop.f32.mrb[7].mxu0 }
 0x7bc   : > { %v1671_v4 = vadd.f32 %v1668_v0, %v3824_v31  ;;  %v2213_v0 = vld [vmem:[#allocation26] ss:$0 sm:$0xff] }
 0x7be   : > { %v1674_v6 = vsel %vm812_vm3, %v1671_v4, 0.0 }
 0x7bf   : > { %1675 = vadd.xlane.f32.xlu0 %v1674_v6 }
 0x84c   : > { %v1676_v7 = vpop.xlane.xlu0 %1675 }
 0x84d   : > { %v1678_v8 = vmul.f32 0.03125, %v1676_v7 }
 0x84f   : > { %v1679_v9 = vsub.f32 %v1671_v4, %v1678_v8  ;;  %v2214_v4 = vld [vmem:[#allocation27] ss:$0 sm:$0xff] }
 0x851   : > { %v1680_v10 = vmul.f32 %v1679_v9, %v1679_v9 }
 0x853   : > { %v1681_v11 = vsel %vm812_vm3, %v1680_v10, 0.0 }
 0x854   : > { %1682 = vadd.xlane.f32.xlu1 %v1681_v11 }
 0x8e1   : > { %v1683_v31 = vpop.xlane.xlu1 %1682 }
 0x8e2   : > { %v1684_v17 = vmul.f32 0.03125, %v1683_v31 }
 0x8e4   : > { %v1685_v18 = vadd.f32 1e-07, %v1684_v17 }
 0x8e6   : > { %2609 = vrsqrt.f32 %v1685_v18 }
 0x8f0   : > { %v2610_v19 = vpop.eup %2609 }
 0x8f1   : > { %v1687_v21 = vmul.f32 %v2610_v19, %v1679_v9 }
 0x8f3   : > { %v1694_v23 = vmul.f32 %v2207_v20, %v1687_v21 }
 0x8f5   : > { %v1701_v24 = vadd.f32 %v2208_v22, %v1694_v23 }
 0x8f7   : > { %2330 = vmatmul.mubr.msk.f32.vlgmr.msra.gmra.mrb[12].mxu1 %vm812_vm3, %v1701_v24 }
 0x9ca   : > { %v1782_v38 = vpop.f32.mrb[12].mxu1 }
 0x9cb   : > { %v1783_v39 = vadd.f32 %v2209_v37, %v1782_v38  ;;  %v2331_v40 = vpop.f32.mrb[13].mxu1 }
 0x9cd   : > { %v1787_v41 = vmul.f32 %v1783_v39, %v1783_v39  ;;  %v1786_v47 = vmul.f32 0.5, %v1783_v39 }
 0x9cf   : > { %v1788_v42 = vmul.f32 %v1787_v41, %v1783_v39 }
 0x9d1   : > { %v1789_v43 = vmul.f32 0.044715, %v1788_v42 }
 0x9d3   : > { %v1790_v44 = vadd.f32 %v1789_v43, %v1783_v39 }
 0x9d5   : > { %v1791_v45 = vmul.f32 0.7978846, %v1790_v44 }
 0x9d7   : > { %2611 = vtanh.f32 %v1791_v45 }
 0x9e1   : > { %v2612_v46 = vpop.eup %2611 }
 0x9e2   : > { %v1793_v48 = vadd.f32 1.0, %v2612_v46 }
 0x9e4   : > { %v1794_v49 = vmul.f32 %v1793_v48, %v1786_v47 }
 0x9e6   : > { %2349 = vmatmul.mubr.msk.f32.vlgmr.msra.gmra.mrb[8].mxu0 %vm1810_vm9, %v1794_v49 }
 0xab9   : > { %v1880_v50 = vpop.f32.mrb[8].mxu0 }
 0xaba   : > { %v1881_v51 = vadd.f32 %v2211_v1, %v1880_v50  ;;  %v2350_v52 = vpop.f32.mrb[9].mxu0 }
 0xabc   : > { %v1884_v53 = vadd.f32 %v1881_v51, %v1701_v24 }
 0xabe   : > { %v1887_v54 = vsel %vm812_vm3, %v1884_v53, 0.0 }
 0xabf   : > { %1888 = vadd.xlane.f32.xlu0 %v1887_v54 }
 0xb4c   : > { %v1889_v55 = vpop.xlane.xlu0 %1888 }
 0xb4d   : > { %v1890_v56 = vmul.f32 0.03125, %v1889_v55 }
 0xb4f   : > { %v1891_v57 = vsub.f32 %v1884_v53, %v1890_v56 }
 0xb51   : > { %v1892_v58 = vmul.f32 %v1891_v57, %v1891_v57 }
 0xb53   : > { %v1893_v59 = vsel %vm812_vm3, %v1892_v58, 0.0 }
 0xb54   : > { %1894 = vadd.xlane.f32.xlu0 %v1893_v59 }
 0xbe1   : > { %v1895_v60 = vpop.xlane.xlu0 %1894 }
 0xbe2   : > { %v1896_v61 = vmul.f32 0.03125, %v1895_v60 }
 0xbe4   : > { %v1897_v62 = vadd.f32 1e-07, %v1896_v61 }
 0xbe6   : > { %2613 = vrsqrt.f32 %v1897_v62 }
 0xbf0   : > { %v2614_v63 = vpop.eup %2613 }
 0xbf1   : > { %v1899_v3 = vmul.f32 %v2614_v63, %v1891_v57 }
 0xbf3   : > { %v1906_v6 = vmul.f32 %v2213_v0, %v1899_v3 }
 0xbf5   : > { %v1913_v7 = vadd.f32 %v2214_v4, %v1906_v6 }
 0xbf7   : > { %1914 = vst.msk [vmem:[%s753_s25] sm:$0xff] %vm812_vm3, %v1913_v7 }
 0xbf8   : > { %3080 = shalt.err (!%p3077_p4)
}
 0xbf9   : > { %s3081_s20 = scalar_lea.hbm %s3922_s29, 128  ;;  %s3085_s17 = scalar_lea.hbm %s4052_s4, 256 }
 0xbfa   : > { %p3082_p5 = scmp.ne.s32.totalorder %s3922_s29, %s3081_s20  ;;  %p3086_p6 = scmp.lt.u32.totalorder %s3922_s29, %s4052_s4 }
 0xbfb   : > { %p3087_p11 = scmp.lt.u32.totalorder %s3085_s17, %s3081_s20  ;;  %p3089_p9 = scmp.lt.u32.totalorder %s3081_s20, %s3922_s29 }
 0xbfc   : > { %p3083_p7 = pnand %p3082_p5, %p4053_p12 }
 0xbfd   : > { %p3088_p8 = por %p3087_p11, %p3086_p6 }
 0xbfe   : > { %p3084_p0 = pneg %p3083_p7 }
 0xbff   : > { %p3090_p13 = por %p3089_p9, %p3088_p8 }
 0xc01   : > { %p3091_p1 = pnand %p3090_p13, %p3084_p0 }
 0xc03   : > { %3094 = shalt.err (!%p3091_p1)
}
 0xc04   : > { %2441 = dma.vmem_to_hbm [thread:$0]  (%p4053_p12), %s3924_s18, 128, %s3922_s29, %s1916_s21  }
 0xc05 PF: > { %s4054_s5 = sld [smem:[#allocation41_spill]]  ;;  %p4055_p3 = scmp.ne.s32.totalorder %s4025_s19, 0 }
 0xc06   : > { %p4056_p2 = scmp.ge.s32.totalorder %s3169_s24, 2 }
 0xc08   : > { %p2494_p10 = pnand %p4056_p2, %p4055_p3 }
 0xc0b   : > { %s1941_s16 = sand.u32 1, %s4054_s5  }
 0xc0c   : > { %s1942_s22 = scalar_lea.sflag [#allocation5], %s1941_s16 }
 0xc0d   : > { %3152 = dma.done.wait (!%p2494_p10), %s1942_s22, 128  }
 0xc0e   : > { %3154 = vsyncadd (!%p2494_p10), %s1942_s22, 4294967168  ;;  %s4057_s21 = sld [smem:[#allocation42_spill]]  ;;  %p39_p4 = scmp.ge.s32.totalorder %s3653_s27, 4  }
 0xc0f   : > { %s4058_s22 = smov %s3165_s23  ;;  %s4059_s23 = smov %s3664_s2 }
 0xc10   : > { %s4060_s24 = smov %s3653_s27  ;;  %41 = sbr.rel (!%p39_p4) target bundleno = 24 (0x18), region = 198 }
 0xc17   :  { %1947 = vsyncpa [#allocation4], 1 }
 0xc18   :  { %1949 = vsyncpa [#allocation4 + $0x1], 1 }
 0xc19   :  { %1950 = vsyncpa [#allocation7], 1 }
 0xc1a   :  { %1952 = vsyncpa [#allocation7 + $0x1], 1 }
 0xc1b   :  { %1953 = vsyncpa [#allocation10], 1 }
 0xc1c   :  { %1954 = vsyncpa [#allocation13], 1 }
 0xc1d   :  { %1955 = vsyncpa [#allocation16], 1 }
 0xc1e   :  { %1956 = vsyncpa [#allocation19], 1 }
 0xc1f   :  { %1957 = vsyncpa [#allocation22], 1 }
 0xc20   :  { %1958 = vsyncpa [#allocation25], 1 }
 0xc21   :  { %1959 = vsyncpa [#allocation28], 1 }
 0xc22   :  { %1960 = vsyncpa [#allocation5], 1 }
 0xc23   :  { %1962 = vsyncpa [#allocation5 + $0x1], 1 }

</bundles_post_ra>
